<compile_context>
chip_gen: v6e
topology: v6e:2x2x1
jax: 0.10.0
libtpu: 0.0.40
codegen_flags: <defaults>
</compile_context>

<pallas_src>
import functools
import math

import jax
import jax.numpy as jnp
from jax.experimental import pallas as pl
from jax.experimental.pallas import tpu as pltpu

# Full-f32 matmuls everywhere (reference included) — LayerNorm amplifies bf16-pass error.
jax.config.update("jax_default_matmul_precision", "highest")

_HI = jax.lax.Precision.HIGHEST


def _fused_mha_ln_kernel(q_ref, k_ref, v_ref, w_in_ref, w_out_ref, aux_ref,
                         o_ref, *, num_heads, batch):
    LN, E = q_ref.shape          # rows ordered (position, batch)
    SN = k_ref.shape[0]
    H = num_heads
    D = E // H
    N = batch
    scale = 1.0 / math.sqrt(D)

    # ---- fused QKV projection: one MXU push covers q/k/v x Wq/Wk/Wv ----
    x = jnp.concatenate([q_ref[...], k_ref[...], v_ref[...]], axis=0)      # (LN+2SN, E)
    y = jnp.dot(x, w_in_ref[...],
                preferred_element_type=jnp.float32, precision=_HI)         # (LN+2SN, 3E)

    aux = aux_ref[...]                                                     # (6, E)
    b_q, b_k, b_v = aux[0:1, :], aux[1:2, :], aux[2:3, :]
    b_o, gamma, beta = aux[3:4, :], aux[4:5, :], aux[5:6, :]

    Q = y[:LN, 0:E] + b_q                                                  # (LN, E)
    K = y[LN:LN + SN, E:2 * E] + b_k                                       # (SN, E)
    V = y[LN + SN:, 2 * E:3 * E] + b_v                                     # (SN, E)

    # ---- split heads once, then batch every per-head matmul over H ----
    Qh = jnp.stack([Q[:, h * D:(h + 1) * D] for h in range(H)], axis=0)    # (H, LN, D)
    Kh = jnp.stack([K[:, h * D:(h + 1) * D] for h in range(H)], axis=0)    # (H, SN, D)
    Vh = jnp.stack([V[:, h * D:(h + 1) * D] for h in range(H)], axis=0)    # (H, SN, D)

    # Batch folded into score rows/cols; mask cross-batch pairs (exact).
    row_b = jax.lax.broadcasted_iota(jnp.int32, (LN, SN), 0) % N
    col_b = jax.lax.broadcasted_iota(jnp.int32, (LN, SN), 1) % N
    neg = jnp.where(row_b == col_b, 0.0, -1e30).astype(jnp.float32)        # (LN, SN)

    s = jnp.einsum('hqd,hkd->hqk', Qh, Kh,
                   preferred_element_type=jnp.float32, precision=_HI)      # (H, LN, SN)
    s = s * scale + neg
    s = s - jnp.max(s, axis=-1, keepdims=True)
    p = jnp.exp(s)
    p = p / jnp.sum(p, axis=-1, keepdims=True)       # exact denom (LN amplifies errors)

    attn = jnp.einsum('hqk,hkd->hqd', p, Vh,
                      preferred_element_type=jnp.float32, precision=_HI)   # (H, LN, D)

    # ---- output projection without concatenating heads ----
    out = jnp.einsum('hqd,hde->hqe', attn, w_out_ref[...],
                     preferred_element_type=jnp.float32, precision=_HI)    # (H, LN, E)
    out = jnp.sum(out, axis=0) + b_o                                       # (LN, E)

    # ---- LayerNorm over E (PyTorch default eps = 1e-5) ----
    mu = jnp.mean(out, axis=-1, keepdims=True)
    var = jnp.mean((out - mu) * (out - mu), axis=-1, keepdims=True)
    o_ref[...] = ((out - mu) * jax.lax.rsqrt(var + 1e-5) * gamma
                  + beta).astype(o_ref.dtype)


def cross_attention_layer(query, key, value, params, *, num_heads):
    """query/key/value: (L, N, E) float32, PyTorch seq-first layout."""
    L, N, E = query.shape
    S = key.shape[0]
    D = E // num_heads

    # Pure row-major relabels (no data movement): rows ordered (position, batch).
    q2 = query.reshape(L * N, E)
    k2 = key.reshape(S * N, E)
    v2 = value.reshape(S * N, E)

    in_w = params["in_proj_weight"]       # (3E, E) rows = [Wq; Wk; Wv]
    in_b = params["in_proj_bias"]         # (3E,)
    w_in_t = in_w.T                       # (E, 3E): columns = [Wq^T | Wk^T | Wv^T]
    # out_proj: attn_flat @ Wo^T  ->  Wo^T reshaped (H, D, E) for head-batched contraction
    w_out3 = params["out_proj_weight"].T.reshape(num_heads, D, E)
    aux = jnp.stack([in_b[:E], in_b[E:2 * E], in_b[2 * E:],
                     params["out_proj_bias"],
                     params["ln_weight"], params["ln_bias"]], axis=0)      # (6, E)

    out = pl.pallas_call(
        functools.partial(_fused_mha_ln_kernel, num_heads=num_heads, batch=N),
        out_shape=jax.ShapeDtypeStruct((L * N, E), jnp.float32),
        in_specs=[pl.BlockSpec(memory_space=pltpu.MemorySpace.VMEM)] * 6,
        out_specs=pl.BlockSpec(memory_space=pltpu.MemorySpace.VMEM),
    )(q2, k2, v2, w_in_t, w_out3, aux)

    # Rows are (l, n)-ordered, so this reshape is a pure row-major relabel (no transpose).
    return out.reshape(L, N, E)


def _reference(query, key, value, params, *, num_heads):
    """Pure-JAX reference mirroring nn.MultiheadAttention + LayerNorm."""
    L, N, E = query.shape
    S = key.shape[0]
    D = E // num_heads
    in_w, in_b = params["in_proj_weight"], params["in_proj_bias"]
    Q = query @ in_w[:E].T + in_b[:E]
    K = key @ in_w[E:2 * E].T + in_b[E:2 * E]
    V = value @ in_w[2 * E:].T + in_b[2 * E:]
    Qh = Q.transpose(1, 0, 2).reshape(N, L, num_heads, D).transpose(0, 2, 1, 3)
    Kh = K.transpose(1, 0, 2).reshape(N, S, num_heads, D).transpose(0, 2, 1, 3)
    Vh = V.transpose(1, 0, 2).reshape(N, S, num_heads, D).transpose(0, 2, 1, 3)
    s = jnp.einsum("nhld,nhsd->nhls", Qh, Kh, precision=_HI) / math.sqrt(D)
    p = jax.nn.softmax(s, axis=-1)
    o = jnp.einsum("nhls,nhsd->nhld", p, Vh, precision=_HI)
    o = o.transpose(0, 2, 1, 3).reshape(N, L, E).transpose(1, 0, 2)
    o = o @ params["out_proj_weight"].T + params["out_proj_bias"]
    mu = jnp.mean(o, axis=-1, keepdims=True)
    var = jnp.mean((o - mu) ** 2, axis=-1, keepdims=True)
    return (o - mu) / jnp.sqrt(var + 1e-5) * params["ln_weight"] + params["ln_bias"]


if __name__ == "__main__":
    embed_dim = 32
    num_heads = 4
    L, S, N = 8, 8, 2   # target seq len, source seq len, batch

    root = jax.random.PRNGKey(0)
    k1, k2, k3, k4, k5, k6, k7 = jax.random.split(root, 7)

    params = {
        "in_proj_weight": 0.05 * jax.random.normal(k1, (3 * embed_dim, embed_dim), jnp.float32),
        "in_proj_bias": 0.01 * jax.random.normal(k2, (3 * embed_dim,), jnp.float32),
        "out_proj_weight": 0.05 * jax.random.normal(k3, (embed_dim, embed_dim), jnp.float32),
        "out_proj_bias": 0.01 * jax.random.normal(k4, (embed_dim,), jnp.float32),
        "ln_weight": jnp.ones((embed_dim,), jnp.float32),
        "ln_bias": jnp.zeros((embed_dim,), jnp.float32),
    }

    query = jax.random.normal(k5, (L, N, embed_dim), jnp.float32)
    key = jax.random.normal(k6, (S, N, embed_dim), jnp.float32)
    value = jax.random.normal(k7, (S, N, embed_dim), jnp.float32)

    out = cross_attention_layer(query, key, value, params, num_heads=num_heads)
    out = jax.block_until_ready(out)

    ref = _reference(query, key, value, params, num_heads=num_heads)
    ref = jax.block_until_ready(ref)

    assert out.shape == (L, N, embed_dim)
    assert bool(jnp.max(jnp.abs(out - ref)) < 2e-3), "mismatch vs pure-JAX reference"

    print("KERNEL_OK")
</pallas_src>

<mosaic_0001>
module attributes {stable_mosaic.version = 11 : i64} {
  func.func @_fused_mha_ln_kernel(%arg0: memref<16x32xf32, #tpu.memory_space<vmem>>, %arg1: memref<16x32xf32, #tpu.memory_space<vmem>>, %arg2: memref<16x32xf32, #tpu.memory_space<vmem>>, %arg3: memref<32x96xf32, #tpu.memory_space<vmem>>, %arg4: memref<4x8x32xf32, #tpu.memory_space<vmem>>, %arg5: memref<6x32xf32, #tpu.memory_space<vmem>>, %arg6: memref<16x32xf32, #tpu.memory_space<vmem>>) attributes {dimension_semantics = [], scalar_prefetch = 0 : i64, scratch_operands = 0 : i64, tpu.core_type = #tpu.core_type<tc>} {
    %c0 = arith.constant 0 : index
    %c0_0 = arith.constant 0 : index
    %0 = vector.load %arg0[%c0, %c0_0] : memref<16x32xf32, #tpu.memory_space<vmem>>, vector<16x32xf32>
    %c0_1 = arith.constant 0 : index
    %c0_2 = arith.constant 0 : index
    %1 = vector.load %arg1[%c0_1, %c0_2] : memref<16x32xf32, #tpu.memory_space<vmem>>, vector<16x32xf32>
    %c0_3 = arith.constant 0 : index
    %c0_4 = arith.constant 0 : index
    %2 = vector.load %arg2[%c0_3, %c0_4] : memref<16x32xf32, #tpu.memory_space<vmem>>, vector<16x32xf32>
    %3 = tpu.concatenate %0, %1, %2 in 0 : vector<16x32xf32>, vector<16x32xf32>, vector<16x32xf32> -> vector<48x32xf32>
    %c0_5 = arith.constant 0 : index
    %c0_6 = arith.constant 0 : index
    %4 = vector.load %arg3[%c0_5, %c0_6] : memref<32x96xf32, #tpu.memory_space<vmem>>, vector<32x96xf32>
    %cst = arith.constant dense<0.000000e+00> : vector<48x96xf32>
    %5 = tpu.matmul %3, %4, %cst {dimension_numbers = #tpu.dot_dimension_numbers<[1], [0], [0], [1], [0, 0, 1, 1], [], []>, precision = #tpu.contract_precision<fp32>} : vector<48x32xf32>, vector<32x96xf32>, vector<48x96xf32> -> vector<48x96xf32>
    %c0_7 = arith.constant 0 : index
    %c0_8 = arith.constant 0 : index
    %6 = vector.load %arg5[%c0_7, %c0_8] : memref<6x32xf32, #tpu.memory_space<vmem>>, vector<6x32xf32>
    %7 = vector.extract_strided_slice %6 {offsets = [0, 0], sizes = [1, 32], strides = [1, 1]} : vector<6x32xf32> to vector<1x32xf32>
    %8 = vector.extract_strided_slice %6 {offsets = [1, 0], sizes = [1, 32], strides = [1, 1]} : vector<6x32xf32> to vector<1x32xf32>
    %9 = vector.extract_strided_slice %6 {offsets = [2, 0], sizes = [1, 32], strides = [1, 1]} : vector<6x32xf32> to vector<1x32xf32>
    %10 = vector.extract_strided_slice %6 {offsets = [3, 0], sizes = [1, 32], strides = [1, 1]} : vector<6x32xf32> to vector<1x32xf32>
    %11 = vector.extract_strided_slice %6 {offsets = [4, 0], sizes = [1, 32], strides = [1, 1]} : vector<6x32xf32> to vector<1x32xf32>
    %12 = vector.extract_strided_slice %6 {offsets = [5, 0], sizes = [1, 32], strides = [1, 1]} : vector<6x32xf32> to vector<1x32xf32>
    %13 = vector.extract_strided_slice %5 {offsets = [0, 0], sizes = [16, 32], strides = [1, 1]} : vector<48x96xf32> to vector<16x32xf32>
    %14 = vector.broadcast %7 : vector<1x32xf32> to vector<16x32xf32>
    %15 = arith.addf %13, %14 : vector<16x32xf32>
    %16 = vector.extract_strided_slice %5 {offsets = [16, 32], sizes = [16, 32], strides = [1, 1]} : vector<48x96xf32> to vector<16x32xf32>
    %17 = vector.broadcast %8 : vector<1x32xf32> to vector<16x32xf32>
    %18 = arith.addf %16, %17 : vector<16x32xf32>
    %19 = vector.extract_strided_slice %5 {offsets = [32, 64], sizes = [16, 32], strides = [1, 1]} : vector<48x96xf32> to vector<16x32xf32>
    %20 = vector.broadcast %9 : vector<1x32xf32> to vector<16x32xf32>
    %21 = arith.addf %19, %20 : vector<16x32xf32>
    %22 = vector.extract_strided_slice %15 {offsets = [0, 0], sizes = [16, 8], strides = [1, 1]} : vector<16x32xf32> to vector<16x8xf32>
    %23 = vector.extract_strided_slice %15 {offsets = [0, 8], sizes = [16, 8], strides = [1, 1]} : vector<16x32xf32> to vector<16x8xf32>
    %24 = vector.extract_strided_slice %15 {offsets = [0, 16], sizes = [16, 8], strides = [1, 1]} : vector<16x32xf32> to vector<16x8xf32>
    %25 = vector.extract_strided_slice %15 {offsets = [0, 24], sizes = [16, 8], strides = [1, 1]} : vector<16x32xf32> to vector<16x8xf32>
    %26 = vector.shape_cast %22 : vector<16x8xf32> to vector<1x16x8xf32>
    %27 = vector.shape_cast %23 : vector<16x8xf32> to vector<1x16x8xf32>
    %28 = vector.shape_cast %24 : vector<16x8xf32> to vector<1x16x8xf32>
    %29 = vector.shape_cast %25 : vector<16x8xf32> to vector<1x16x8xf32>
    %30 = tpu.concatenate %26, %27, %28, %29 in 0 : vector<1x16x8xf32>, vector<1x16x8xf32>, vector<1x16x8xf32>, vector<1x16x8xf32> -> vector<4x16x8xf32>
    %31 = vector.extract_strided_slice %18 {offsets = [0, 0], sizes = [16, 8], strides = [1, 1]} : vector<16x32xf32> to vector<16x8xf32>
    %32 = vector.extract_strided_slice %18 {offsets = [0, 8], sizes = [16, 8], strides = [1, 1]} : vector<16x32xf32> to vector<16x8xf32>
    %33 = vector.extract_strided_slice %18 {offsets = [0, 16], sizes = [16, 8], strides = [1, 1]} : vector<16x32xf32> to vector<16x8xf32>
    %34 = vector.extract_strided_slice %18 {offsets = [0, 24], sizes = [16, 8], strides = [1, 1]} : vector<16x32xf32> to vector<16x8xf32>
    %35 = vector.shape_cast %31 : vector<16x8xf32> to vector<1x16x8xf32>
    %36 = vector.shape_cast %32 : vector<16x8xf32> to vector<1x16x8xf32>
    %37 = vector.shape_cast %33 : vector<16x8xf32> to vector<1x16x8xf32>
    %38 = vector.shape_cast %34 : vector<16x8xf32> to vector<1x16x8xf32>
    %39 = tpu.concatenate %35, %36, %37, %38 in 0 : vector<1x16x8xf32>, vector<1x16x8xf32>, vector<1x16x8xf32>, vector<1x16x8xf32> -> vector<4x16x8xf32>
    %40 = vector.extract_strided_slice %21 {offsets = [0, 0], sizes = [16, 8], strides = [1, 1]} : vector<16x32xf32> to vector<16x8xf32>
    %41 = vector.extract_strided_slice %21 {offsets = [0, 8], sizes = [16, 8], strides = [1, 1]} : vector<16x32xf32> to vector<16x8xf32>
    %42 = vector.extract_strided_slice %21 {offsets = [0, 16], sizes = [16, 8], strides = [1, 1]} : vector<16x32xf32> to vector<16x8xf32>
    %43 = vector.extract_strided_slice %21 {offsets = [0, 24], sizes = [16, 8], strides = [1, 1]} : vector<16x32xf32> to vector<16x8xf32>
    %44 = vector.shape_cast %40 : vector<16x8xf32> to vector<1x16x8xf32>
    %45 = vector.shape_cast %41 : vector<16x8xf32> to vector<1x16x8xf32>
    %46 = vector.shape_cast %42 : vector<16x8xf32> to vector<1x16x8xf32>
    %47 = vector.shape_cast %43 : vector<16x8xf32> to vector<1x16x8xf32>
    %48 = tpu.concatenate %44, %45, %46, %47 in 0 : vector<1x16x8xf32>, vector<1x16x8xf32>, vector<1x16x8xf32>, vector<1x16x8xf32> -> vector<4x16x8xf32>
    %49 = tpu.iota {dimensions = array<i32: 0>} : vector<16x16xi32>
    %c2_i32 = arith.constant 2 : i32
    %c0_i32 = arith.constant 0 : i32
    %50 = arith.cmpi eq, %c2_i32, %c0_i32 : i32
    %c1_i32 = arith.constant 1 : i32
    %51 = arith.select %50, %c1_i32, %c2_i32 : i32
    %52 = vector.broadcast %51 : i32 to vector<16x16xi32>
    %53 = arith.remsi %49, %52 : vector<16x16xi32>
    %c0_i32_9 = arith.constant 0 : i32
    %54 = vector.broadcast %c0_i32_9 : i32 to vector<16x16xi32>
    %55 = arith.cmpi ne, %53, %54 : vector<16x16xi32>
    %c0_i32_10 = arith.constant 0 : i32
    %56 = vector.broadcast %c0_i32_10 : i32 to vector<16x16xi32>
    %57 = arith.cmpi slt, %53, %56 : vector<16x16xi32>
    %c0_i32_11 = arith.constant 0 : i32
    %58 = arith.cmpi slt, %51, %c0_i32_11 : i32
    %59 = vector.broadcast %58 : i1 to vector<16x16xi1>
    %60 = vector.broadcast %59 : vector<16x16xi1> to vector<16x16xi1>
    %61 = arith.xori %57, %60 : vector<16x16xi1>
    %62 = arith.andi %61, %55 : vector<16x16xi1>
    %63 = vector.broadcast %51 : i32 to vector<16x16xi32>
    %64 = arith.addi %53, %63 : vector<16x16xi32>
    %65 = arith.select %62, %64, %53 : vector<16x16xi1>, vector<16x16xi32>
    %66 = tpu.iota {dimensions = array<i32: 1>} : vector<16x16xi32>
    %c2_i32_12 = arith.constant 2 : i32
    %c0_i32_13 = arith.constant 0 : i32
    %67 = arith.cmpi eq, %c2_i32_12, %c0_i32_13 : i32
    %c1_i32_14 = arith.constant 1 : i32
    %68 = arith.select %67, %c1_i32_14, %c2_i32_12 : i32
    %69 = vector.broadcast %68 : i32 to vector<16x16xi32>
    %70 = arith.remsi %66, %69 : vector<16x16xi32>
    %c0_i32_15 = arith.constant 0 : i32
    %71 = vector.broadcast %c0_i32_15 : i32 to vector<16x16xi32>
    %72 = arith.cmpi ne, %70, %71 : vector<16x16xi32>
    %c0_i32_16 = arith.constant 0 : i32
    %73 = vector.broadcast %c0_i32_16 : i32 to vector<16x16xi32>
    %74 = arith.cmpi slt, %70, %73 : vector<16x16xi32>
    %c0_i32_17 = arith.constant 0 : i32
    %75 = arith.cmpi slt, %68, %c0_i32_17 : i32
    %76 = vector.broadcast %75 : i1 to vector<16x16xi1>
    %77 = vector.broadcast %76 : vector<16x16xi1> to vector<16x16xi1>
    %78 = arith.xori %74, %77 : vector<16x16xi1>
    %79 = arith.andi %78, %72 : vector<16x16xi1>
    %80 = vector.broadcast %68 : i32 to vector<16x16xi32>
    %81 = arith.addi %70, %80 : vector<16x16xi32>
    %82 = arith.select %79, %81, %70 : vector<16x16xi1>, vector<16x16xi32>
    %83 = arith.cmpi eq, %65, %82 : vector<16x16xi32>
    %cst_18 = arith.constant 0.000000e+00 : f32
    %cst_19 = arith.constant -1.000000e+30 : f32
    %84 = vector.broadcast %cst_18 : f32 to vector<16x16xf32>
    %85 = vector.broadcast %cst_19 : f32 to vector<16x16xf32>
    %86 = arith.select %83, %84, %85 : vector<16x16xi1>, vector<16x16xf32>
    "tpu.trace_start"() <{level = 10 : i32, message = "hqd,hkd->hqk"}> : () -> ()
    %cst_20 = arith.constant dense<0.000000e+00> : vector<4x16x16xf32>
    %87 = tpu.matmul %30, %39, %cst_20 {dimension_numbers = #tpu.dot_dimension_numbers<[2], [2], [1], [1], [0, 0, 0, 1, 1, 1], [0], [0]>, precision = #tpu.contract_precision<fp32>} : vector<4x16x8xf32>, vector<4x16x8xf32>, vector<4x16x16xf32> -> vector<4x16x16xf32>
    "tpu.trace_stop"() : () -> ()
    %cst_21 = arith.constant 0.353553385 : f32
    %88 = vector.broadcast %cst_21 : f32 to vector<4x16x16xf32>
    %89 = arith.mulf %87, %88 : vector<4x16x16xf32>
    %90 = vector.shape_cast %86 : vector<16x16xf32> to vector<1x16x16xf32>
    %91 = vector.broadcast %90 : vector<1x16x16xf32> to vector<4x16x16xf32>
    %92 = arith.addf %89, %91 : vector<4x16x16xf32>
    %cst_22 = arith.constant dense<0xFF800000> : vector<4x16xf32>
    %93 = vector.multi_reduction <maximumf>, %92, %cst_22 [2] : vector<4x16x16xf32> to vector<4x16xf32>
    %94 = vector.shape_cast %93 : vector<4x16xf32> to vector<4x16x1xf32>
    %95 = vector.broadcast %94 : vector<4x16x1xf32> to vector<4x16x16xf32>
    %96 = arith.subf %92, %95 : vector<4x16x16xf32>
    %97 = math.exp %96 : vector<4x16x16xf32>
    %cst_23 = arith.constant dense<0.000000e+00> : vector<4x16xf32>
    %98 = vector.multi_reduction <add>, %97, %cst_23 [2] : vector<4x16x16xf32> to vector<4x16xf32>
    %99 = vector.shape_cast %98 : vector<4x16xf32> to vector<4x16x1xf32>
    %100 = vector.broadcast %99 : vector<4x16x1xf32> to vector<4x16x16xf32>
    %101 = arith.divf %97, %100 : vector<4x16x16xf32>
    "tpu.trace_start"() <{level = 10 : i32, message = "hqk,hkd->hqd"}> : () -> ()
    %cst_24 = arith.constant dense<0.000000e+00> : vector<4x16x8xf32>
    %102 = tpu.matmul %101, %48, %cst_24 {dimension_numbers = #tpu.dot_dimension_numbers<[2], [1], [1], [2], [0, 0, 0, 1, 1, 2], [0], [0]>, precision = #tpu.contract_precision<fp32>} : vector<4x16x16xf32>, vector<4x16x8xf32>, vector<4x16x8xf32> -> vector<4x16x8xf32>
    "tpu.trace_stop"() : () -> ()
    %c0_25 = arith.constant 0 : index
    %c0_26 = arith.constant 0 : index
    %c0_27 = arith.constant 0 : index
    %103 = vector.load %arg4[%c0_25, %c0_26, %c0_27] : memref<4x8x32xf32, #tpu.memory_space<vmem>>, vector<4x8x32xf32>
    "tpu.trace_start"() <{level = 10 : i32, message = "hqd,hde->hqe"}> : () -> ()
    %cst_28 = arith.constant dense<0.000000e+00> : vector<4x16x32xf32>
    %104 = tpu.matmul %102, %103, %cst_28 {dimension_numbers = #tpu.dot_dimension_numbers<[2], [1], [1], [2], [0, 0, 0, 1, 1, 2], [0], [0]>, precision = #tpu.contract_precision<fp32>} : vector<4x16x8xf32>, vector<4x8x32xf32>, vector<4x16x32xf32> -> vector<4x16x32xf32>
    "tpu.trace_stop"() : () -> ()
    %cst_29 = arith.constant dense<0.000000e+00> : vector<16x32xf32>
    %105 = vector.multi_reduction <add>, %104, %cst_29 [0] : vector<4x16x32xf32> to vector<16x32xf32>
    %106 = vector.broadcast %10 : vector<1x32xf32> to vector<16x32xf32>
    %107 = arith.addf %105, %106 : vector<16x32xf32>
    %cst_30 = arith.constant dense<0.000000e+00> : vector<16xf32>
    %108 = vector.multi_reduction <add>, %107, %cst_30 [1] : vector<16x32xf32> to vector<16xf32>
    %109 = vector.shape_cast %108 : vector<16xf32> to vector<16x1xf32>
    %cst_31 = arith.constant 3.200000e+01 : f32
    %110 = vector.broadcast %cst_31 : f32 to vector<16x1xf32>
    %111 = arith.divf %109, %110 : vector<16x1xf32>
    %112 = vector.broadcast %111 : vector<16x1xf32> to vector<16x32xf32>
    %113 = arith.subf %107, %112 : vector<16x32xf32>
    %114 = vector.broadcast %111 : vector<16x1xf32> to vector<16x32xf32>
    %115 = arith.subf %107, %114 : vector<16x32xf32>
    %116 = arith.mulf %113, %115 : vector<16x32xf32>
    %cst_32 = arith.constant dense<0.000000e+00> : vector<16xf32>
    %117 = vector.multi_reduction <add>, %116, %cst_32 [1] : vector<16x32xf32> to vector<16xf32>
    %118 = vector.shape_cast %117 : vector<16xf32> to vector<16x1xf32>
    %cst_33 = arith.constant 3.200000e+01 : f32
    %119 = vector.broadcast %cst_33 : f32 to vector<16x1xf32>
    %120 = arith.divf %118, %119 : vector<16x1xf32>
    %121 = vector.broadcast %111 : vector<16x1xf32> to vector<16x32xf32>
    %122 = arith.subf %107, %121 : vector<16x32xf32>
    %cst_34 = arith.constant 9.99999974E-6 : f32
    %123 = vector.broadcast %cst_34 : f32 to vector<16x1xf32>
    %124 = arith.addf %120, %123 : vector<16x1xf32>
    %125 = math.rsqrt %124 : vector<16x1xf32>
    %126 = vector.broadcast %125 : vector<16x1xf32> to vector<16x32xf32>
    %127 = arith.mulf %122, %126 : vector<16x32xf32>
    %128 = vector.broadcast %11 : vector<1x32xf32> to vector<16x32xf32>
    %129 = arith.mulf %127, %128 : vector<16x32xf32>
    %130 = vector.broadcast %12 : vector<1x32xf32> to vector<16x32xf32>
    %131 = arith.addf %129, %130 : vector<16x32xf32>
    %c0_35 = arith.constant 0 : index
    %c0_36 = arith.constant 0 : index
    %132 = vector.load %arg6[%c0_35, %c0_36] : memref<16x32xf32, #tpu.memory_space<vmem>>, vector<16x32xf32>
    tpu.vector_store %arg6[%c0_35, %c0_36], %131 {strides = array<i32>} : memref<16x32xf32, #tpu.memory_space<vmem>>, vector<16x32xf32>,
    return
  }
}

</mosaic_0001>

<bundles_post_ra>
// kernel: tpu_custom_call.1
= control target key start
LH: loop header
LB: loop body
LE: loop exit
PB: predicated region body
PF: predicated region fallthrough
CT: control target
= control target key end

     0   :  { %11 = vsyncpa [#allocation3], 0  ;;  %s9101_s0 = inlined_call_operand.hbm [shape: f32[16,32], index: 0, kind: input, shape index: {}]   ;;  %s9102_s1 = inlined_call_operand.hbm [shape: f32[16,32], index: 1, kind: input, shape index: {}]   ;;  %s9103_s2 = inlined_call_operand.hbm [shape: f32[16,32], index: 2, kind: input, shape index: {}]   ;;  %s9104_s3 = inlined_call_operand.hbm [shape: f32[32,96], index: 3, kind: input, shape index: {}]   ;;  %s9105_s4 = inlined_call_operand.hbm [shape: f32[4,8,32], index: 4, kind: input, shape index: {}]   ;;  %s9106_s5 = inlined_call_operand.vmem [shape: f32[6,32], index: 5, kind: input, shape index: {}]   ;;  %s9107_s6 = inlined_call_operand.hbm [shape: f32[16,32], index: 6, kind: output, shape index: {}]  }
   0x1   :  { %12 = vsyncpa [#allocation6], 0 }
   0x2   :  { %13 = vsyncpa [#allocation9], 0 }
   0x3   :  { %14 = vsyncpa [#allocation4], 0  ;;  %s8279_s21 = smov [#allocation5]   ;;  %s8280_s23 = smov [#allocation8]  }
   0x4   :  { %s32_s22 = sshll.u32 %s8279_s21, 4  ;;  %s56_s24 = sshll.u32 %s8280_s23, 4  ;;  %s33_s22 = int_to_ptr.vmem [resolvable:$true] %s32_s22  ;;  %s57_s24 = int_to_ptr.vmem [resolvable:$true] %s56_s24 }
   0x5   :  { %s8159_s25 = scalar_lea.vmem %s33_s22, 256  ;;  %p8164_p1 = scmp.lt.s32.totalorder %s33_s22, %s33_s22 }
   0x6   :  { %p8160_p0 = scmp.ne.s32.totalorder %s33_s22, %s8159_s25  ;;  %p8165_p2 = scmp.lt.s32.totalorder %s8159_s25, %s8159_s25 }
   0x8   :  { %p8166_p3 = por %p8165_p2, %p8164_p1 }
   0xa   :  { %p8167_p4 = pnand %p8166_p3, %p8160_p0 }
   0xc   :  { %8170 = shalt.err (!%p8167_p4)
}
   0xd   :  { %s8281_s26 = smov 128   ;;  %s8282_s27 = smov 8  }
   0xe   :  { %38 = dma.hbm_to_vmem [thread:$0]  %s9102_s1, 256, %s33_s22, [#allocation6], %s8281_s26, %s8281_s26, %s8282_s27  }
   0xf   :  { %s8179_s30 = scalar_lea.vmem %s57_s24, 512  ;;  %p8184_p6 = scmp.lt.s32.totalorder %s57_s24, %s57_s24 }
  0x10   :  { %p8180_p5 = scmp.ne.s32.totalorder %s57_s24, %s8179_s30  ;;  %p8185_p7 = scmp.lt.s32.totalorder %s8179_s30, %s8179_s30 }
  0x12   :  { %p8186_p8 = por %p8185_p7, %p8184_p6 }
  0x14   :  { %p8187_p9 = pnand %p8186_p8, %p8180_p5 }
  0x16   :  { %8190 = shalt.err (!%p8187_p9)
}
  0x17   :  { %62 = dma.hbm_to_vmem [thread:$0]  %s9104_s3, 512, %s57_s24, [#allocation9], %s8281_s26, %s8281_s26, %s8282_s27  }
  0x18   :  { %s8283_s9 = smov [#allocation2]   ;;  %s8284_s11 = smov [#allocation7]  }
  0x19   :  { %s20_s10 = sshll.u32 %s8283_s9, 4  ;;  %s44_s12 = sshll.u32 %s8284_s11, 4  ;;  %s21_s10 = int_to_ptr.vmem [resolvable:$true] %s20_s10  ;;  %s45_s12 = int_to_ptr.vmem [resolvable:$true] %s44_s12 }
  0x1a   :  { %s8199_s1 = scalar_lea.vmem %s21_s10, 256  ;;  %p8204_p11 = scmp.lt.s32.totalorder %s21_s10, %s21_s10 }
  0x1b   :  { %p8200_p10 = scmp.ne.s32.totalorder %s21_s10, %s8199_s1  ;;  %p8205_p12 = scmp.lt.s32.totalorder %s8199_s1, %s8199_s1 }
  0x1d   :  { %p8206_p13 = por %p8205_p12, %p8204_p11 }
  0x1f   :  { %p8207_p0 = pnand %p8206_p13, %p8200_p10 }
  0x21   :  { %8210 = shalt.err (!%p8207_p0)
}
  0x22   :  { %26 = dma.hbm_to_vmem [thread:$0]  %s9101_s0, 256, %s21_s10, [#allocation3], %s8281_s26, %s8281_s26, %s8282_s27  }
  0x23   :  { %s8219_s3 = scalar_lea.vmem %s45_s12, 256  ;;  %p8224_p2 = scmp.lt.s32.totalorder %s45_s12, %s45_s12 }
  0x24   :  { %p8220_p1 = scmp.ne.s32.totalorder %s45_s12, %s8219_s3  ;;  %p8225_p3 = scmp.lt.s32.totalorder %s8219_s3, %s8219_s3 }
  0x26   :  { %p8226_p4 = por %p8225_p3, %p8224_p2 }
  0x28   :  { %p8227_p5 = pnand %p8226_p4, %p8220_p1 }
  0x2a   :  { %8230 = shalt.err (!%p8227_p5)
}
  0x2b   :  { %50 = dma.hbm_to_vmem [thread:$0]  %s9103_s2, 256, %s45_s12, [#allocation6], %s8281_s26, %s8281_s26, %s8282_s27  }
  0x2c   :  { %s8285_s17 = smov [#allocation10]  }
  0x2d   :  { %s68_s18 = sshll.u32 %s8285_s17, 4  ;;  %s69_s18 = int_to_ptr.vmem [resolvable:$true] %s68_s18 }
  0x2e   :  { %s8239_s19 = scalar_lea.vmem %s69_s18, 512  ;;  %p8244_p7 = scmp.lt.s32.totalorder %s69_s18, %s69_s18 }
  0x2f   :  { %p8240_p6 = scmp.ne.s32.totalorder %s69_s18, %s8239_s19  ;;  %p8245_p8 = scmp.lt.s32.totalorder %s8239_s19, %s8239_s19 }
  0x31   :  { %p8246_p9 = por %p8245_p8, %p8244_p7 }
  0x33   :  { %p8247_p10 = pnand %p8246_p9, %p8240_p6 }
  0x35   :  { %8250 = shalt.err (!%p8247_p10)
}
  0x36   :  { %74 = dma.hbm_to_vmem [thread:$0]  %s9105_s4, 512, %s69_s18, [#allocation9], %s8281_s26, %s8281_s26, %s8282_s27  }
  0x37   :  { %8271 = dma.done.wait [#allocation3], 256  }
  0x38   :  { %8272 = vsyncadd [#allocation3], 4294967040 }
  0x39   :  { %8273 = dma.done.wait [#allocation6], 512  }
  0x3a   :  { %8274 = vsyncadd [#allocation6], 4294966784 }
  0x3b   :  { %8275 = dma.done.wait [#allocation9], 1024  }
  0x3c   :  { %8276 = vsyncadd [#allocation9], 4294966272  ;;  %vm102_vm0 = vcmask 261120   ;;  %v101_v0 = vld [vmem:[#allocation8 + $0x18] sm:$0xff]  ;;  %v100_v1 = vld [vmem:[#allocation8 + $0x10] sm:$0xff]  ;;  %s8286_s21 = smov 32  }
  0x3d   :  { %v99_v2 = vld [vmem:[#allocation8 + $0x8] sm:$0xff]  ;;  %v8359_v3 = vand.u32 4294901760, %v101_v0  ;;  %v8361_v4 = vand.u32 4294901760, %v100_v1  ;;  %v98_v6 = vld [vmem:[#allocation8] sm:$0xff]  ;;  %v92_v7 = vld [vmem:[#allocation2] sm:$0xff]  ;;  %vm939_vm1 = vcmask 64512  }
  0x3e   :  { %v8363_v5 = vand.u32 4294901760, %v99_v2  ;;  %v93_v8 = vld [vmem:[#allocation2 + $0x8] sm:$0xff]  ;;  %v8365_v9 = vand.u32 4294901760, %v98_v6  ;;  %v104_v10 = vsel %vm102_vm0, %v92_v7, 0  ;;  %v94_v12 = vld [vmem:[#allocation5] sm:$0xff]  ;;  %v95_v13 = vld [vmem:[#allocation5 + $0x8] sm:$0xff] }
  0x3f   :  { %v107_v11 = vsel %vm102_vm0, %v93_v8, 0  ;;  %7541 = vmatprep.subr.mxu0 %v8359_v3  ;;  %v276_v14 = vsub.f32 %v101_v0, %v8359_v3  ;;  %v8371_v15 = vand.u32 4294901760, %v104_v10  ;;  %v8376_v17 = vsub.f32 %v100_v1, %v8361_v4  ;;  %v96_v38 = vld [vmem:[#allocation7] sm:$0xff]  ;;  %v97_v39 = vld [vmem:[#allocation7 + $0x8] sm:$0xff]  ;;  %s8287_s22 = smov 120   ;;  %s8288_s23 = smov 112  }
  0x40   :  { %v8373_v16 = vand.u32 4294901760, %v107_v11  ;;  %7542 = vmatpush3.msra.mxu0 %v8359_v3  ;;  %v8380_v18 = vsub.f32 %v99_v2, %v8363_v5  ;;  %v110_v19 = vsel %vm102_vm0, %v94_v12, 0  ;;  %v113_v20 = vsel %vm102_vm0, %v95_v13, 0  ;;  %s8289_s24 = smov 96   ;;  %s8290_s25 = smov 104  }
  0x41   :  { %v8385_v21 = vsub.f32 %v98_v6, %v8365_v9  ;;  %7543 = vmatprep.subr.mxu0 %v8361_v4  ;;  %v8388_v22 = vand.u32 4294901760, %v276_v14  ;;  %v8391_v23 = vsub.f32 %v104_v10, %v8371_v15  ;;  %v8397_v25 = vand.u32 4294901760, %v8376_v17  ;;  %7566 = vmatprep.mubr.f32.mxu1 %v8371_v15  ;;  %s8291_s28 = smov 64  }
  0x42   :  { %v8394_v24 = vsub.f32 %v107_v11, %v8373_v16  ;;  %7544 = vmatpush3.msra.mxu0 %v8361_v4  ;;  %v8402_v26 = vand.u32 4294901760, %v8380_v18  ;;  %v8404_v27 = vand.u32 4294901760, %v110_v19  ;;  %v8406_v28 = vand.u32 4294901760, %v113_v20 }
  0x43   :  { %v8409_v29 = vand.u32 4294901760, %v8385_v21  ;;  %7545 = vmatprep.subr.mxu0 %v8363_v5  ;;  %v278_v30 = vsub.f32 %v276_v14, %v8388_v22  ;;  %v192_v31 = vand.u32 4294901760, %v8391_v23  ;;  %v285_v33 = vsub.f32 %v8376_v17, %v8397_v25 }
  0x44   :  { %v202_v32 = vand.u32 4294901760, %v8394_v24  ;;  %7546 = vmatpush3.msra.mxu0 %v8363_v5  ;;  %v292_v34 = vsub.f32 %v8380_v18, %v8402_v26  ;;  %v8421_v35 = vsub.f32 %v110_v19, %v8404_v27  ;;  %v8424_v36 = vsub.f32 %v113_v20, %v8406_v28 }
  0x45   :  { %v299_v37 = vsub.f32 %v8385_v21, %v8409_v29  ;;  %7547 = vmatprep.subr.mxu0 %v8365_v9  ;;  %v279_v40 = vand.u32 4294901760, %v278_v30  ;;  %v193_v41 = vsub.f32 %v8391_v23, %v192_v31  ;;  %v286_v43 = vand.u32 4294901760, %v285_v33 }
  0x46   :  { %v203_v42 = vsub.f32 %v8394_v24, %v202_v32  ;;  %7548 = vmatpush3.msra.mxu0 %v8365_v9  ;;  %v293_v44 = vand.u32 4294901760, %v292_v34  ;;  %v212_v45 = vand.u32 4294901760, %v8421_v35  ;;  %v222_v46 = vand.u32 4294901760, %v8424_v36 }
  0x47   :  { %7558 = vmatprep.subr.mxu1 %v279_v40  ;;  %v194_v47 = vand.u32 4294901760, %v193_v41  ;;  %7575 = vmatprep.subr.mxu0 %v276_v14  ;;  %v116_v49 = vsel %vm102_vm0, %v96_v38, 0  ;;  %v119_v50 = vsel %vm102_vm0, %v97_v39, 0  ;;  %v300_v55 = vand.u32 4294901760, %v299_v37 }
  0x48   :  { %v204_v48 = vand.u32 4294901760, %v203_v42  ;;  %7559 = vmatpush3.msra.mxu1 %v279_v40  ;;  %v213_v51 = vsub.f32 %v8421_v35, %v212_v45  ;;  %v223_v52 = vsub.f32 %v8424_v36, %v222_v46  ;;  %v8446_v53 = vand.u32 4294901760, %v116_v49 }
  0x49   :  { %v8448_v54 = vand.u32 4294901760, %v119_v50  ;;  %7549 = vmatprep.mubr.f32.mxu0 %v194_v47  ;;  %7560 = vmatprep.subr.mxu1 %v286_v43  ;;  %v822_v2 = vlaneseq  ;;  %vm3008_vm4 = vcmask 130048  }
  0x4a   :  { %7550 = vmatmul.mubr.f32.vlgmr.msra.gmra.mxu0 %v204_v48  ;;  %7561 = vmatpush3.msra.mxu1 %v286_v43  ;;  %v214_v56 = vand.u32 4294901760, %v213_v51  ;;  %v224_v57 = vand.u32 4294901760, %v223_v52  ;;  %v8451_v58 = vsub.f32 %v116_v49, %v8446_v53 }
  0x4b   :  { %v8454_v59 = vsub.f32 %v119_v50, %v8448_v54  ;;  %7562 = vmatprep.subr.mxu1 %v293_v44  ;;  %7576 = vmatpush3.msra.mxu0 %v276_v14  ;;  %v8492_v6 = vshrl.u32 %v822_v2, 7 }
  0x4c   :  { %7552 = vmatprep.mubr.f32.mxu0 %v214_v56  ;;  %7563 = vmatpush3.msra.mxu1 %v293_v44  ;;  %v232_v60 = vand.u32 4294901760, %v8451_v58 }
  0x4d   :  { %v242_v61 = vand.u32 4294901760, %v8454_v59  ;;  %7564 = vmatprep.subr.mxu1 %v300_v55  ;;  %7577 = vmatprep.subr.mxu0 %v8376_v17  ;;  %v830_v7 = vsub.s32 1, %v8492_v6  ;;  %v824_v37 = vsub.s32 0, %v8492_v6 }
  0x4e   :  { %7553 = vmatmul.mubr.f32.gmra.mxu0 %v224_v57  ;;  %7565 = vmatpush3.msra.mxu1 %v300_v55  ;;  %v233_v62 = vsub.f32 %v8451_v58, %v232_v60 }
  0x4f   :  { %v243_v63 = vsub.f32 %v8454_v59, %v242_v61  ;;  %7567 = vmatmul.mubr.f32.vlgmr.msra.gmra.mxu1 %v8373_v16  ;;  %7592 = vmatprep.subr.mxu1 %v8359_v3 }
  0x50   :  { %v234_v0 = vand.u32 4294901760, %v233_v62  ;;  %7578 = vmatpush3.msra.mxu0 %v8376_v17  ;;  %7593 = vmatpush3.msra.mxu1 %v8359_v3 }
  0x51   :  { %v244_v1 = vand.u32 4294901760, %v243_v63  ;;  %7579 = vmatprep.subr.mxu0 %v8380_v18  ;;  %7569 = vmatprep.mubr.f32.mxu1 %v8404_v27 }
  0x52   :  { %7555 = vmatprep.mubr.f32.mxu0 %v234_v0  ;;  %7580 = vmatpush3.msra.mxu0 %v8380_v18 }
  0x53   :  { %7556 = vmatmul.mubr.f32.gmra.mxu0 %v244_v1  ;;  %7594 = vmatprep.subr.mxu1 %v8361_v4 }
  0x54   :  { %7570 = vmatmul.mubr.f32.gmra.mxu1 %v8406_v28  ;;  %7581 = vmatprep.subr.mxu0 %v8385_v21 }
  0x55   :  { %7595 = vmatpush3.msra.mxu1 %v8361_v4  ;;  %7582 = vmatpush3.msra.mxu0 %v8385_v21 }
  0x56   :  { %7583 = vmatprep.mubr.f32.mxu0 %v8391_v23  ;;  %7596 = vmatprep.subr.mxu1 %v8363_v5 }
  0x57   :  { %7584 = vmatmul.mubr.f32.vlgmr.msra.gmra.mxu0 %v8394_v24  ;;  %7572 = vmatprep.mubr.f32.mxu1 %v8446_v53 }
  0x58   :  { %7597 = vmatpush3.msra.mxu1 %v8363_v5  ;;  %7586 = vmatprep.mubr.f32.mxu0 %v8421_v35 }
  0x59   :  { %7573 = vmatmul.mubr.f32.gmra.mxu1 %v8448_v54  ;;  %7598 = vmatprep.subr.mxu1 %v8365_v9 }
  0x5a   :  { %7599 = vmatpush3.msra.mxu1 %v8365_v9  ;;  %7609 = vmatprep.subr.mxu0 %v8388_v22 }
  0x5b   :  { %7587 = vmatmul.mubr.f32.gmra.mxu0 %v8424_v36  ;;  %7600 = vmatprep.mubr.f32.mxu1 %v192_v31 }
  0x5c   :  { %7610 = vmatpush3.msra.mxu0 %v8388_v22  ;;  %7626 = vmatprep.subr.mxu1 %v8359_v3 }
  0x5d   :  { %7601 = vmatmul.mubr.f32.vlgmr.msra.gmra.mxu1 %v202_v32  ;;  %7611 = vmatprep.subr.mxu0 %v8397_v25 }
  0x5e   :  { %7589 = vmatprep.mubr.f32.mxu0 %v8451_v58  ;;  %7612 = vmatpush3.msra.mxu0 %v8397_v25 }
  0x5f   :  { %7627 = vmatpush3.msra.mxu1 %v8359_v3  ;;  %7590 = vmatmul.mubr.f32.gmra.mxu0 %v8454_v59  ;;  %v8510_v3 = vld [vmem:[%s9106_s5] sm:$0x3f] }
  0x60   :  { %7613 = vmatprep.subr.mxu0 %v8402_v26  ;;  %7603 = vmatprep.mubr.f32.mxu1 %v212_v45  ;;  %v831_v8 = vrot.slane %v8510_v3, %v830_v7  ;;  %v825_v47 = vrot.slane %v8510_v3, %v824_v37 }
  0x61   :  { %7614 = vmatpush3.msra.mxu0 %v8402_v26  ;;  %7628 = vmatprep.subr.mxu1 %v8361_v4 }
  0x62   :  { %7604 = vmatmul.mubr.f32.gmra.mxu1 %v222_v46  ;;  %7615 = vmatprep.subr.mxu0 %v8409_v29 }
  0x63   :  { %7629 = vmatpush3.msra.mxu1 %v8361_v4  ;;  %7616 = vmatpush3.msra.mxu0 %v8409_v29 }
  0x64   :  { %7617 = vmatprep.mubr.f32.mxu0 %v8371_v15  ;;  %7630 = vmatprep.subr.mxu1 %v8363_v5 }
  0x65   :  { %7618 = vmatmul.mubr.f32.vlgmr.msra.gmra.mxu0 %v8373_v16  ;;  %7606 = vmatprep.mubr.f32.mxu1 %v232_v60 }
  0x66   :  { %7631 = vmatpush3.msra.mxu1 %v8363_v5  ;;  %7620 = vmatprep.mubr.f32.mxu0 %v8404_v27 }
  0x67   :  { %7607 = vmatmul.mubr.f32.gmra.mxu1 %v242_v61  ;;  %7632 = vmatprep.subr.mxu1 %v8365_v9 }
  0x68   :  { %7633 = vmatpush3.msra.mxu1 %v8365_v9  ;;  %7634 = vmatprep.mubr.f32.mxu1 %v8371_v15 }
  0x69   :  { %7621 = vmatmul.mubr.f32.gmra.mxu0 %v8406_v28  ;;  %833 = vrot.lane.b32.xlu0 %v831_v8, %s8286_s21 }
  0x6a   :  { %7623 = vmatprep.mubr.f32.mxu0 %v8446_v53 }
  0x6b   :  { %7635 = vmatmul.mubr.f32.vlgmr.msra.gmra.mxu1 %v8373_v16 }
  0x6c   :  { %7637 = vmatprep.mubr.f32.mxu1 %v8404_v27 }
  0x6d   :  { %7624 = vmatmul.mubr.f32.gmra.mxu0 %v8448_v54 }
  0x6f   :  { %7638 = vmatmul.mubr.f32.gmra.mxu1 %v8406_v28 }
  0x70   :  { %7640 = vmatprep.mubr.f32.mxu1 %v8446_v53 }
  0x73   :  { %7641 = vmatmul.mubr.f32.gmra.mxu1 %v8448_v54 }
  0xdb   :  { %v834_v0 = vpop.permute.xlu0 %833 }
 0x10a   :  { %v7551_v4 = vpop.f32.mrf.mxu0 }
 0x10c   :  { %v196_v5 = vpop.f32.mrf.mxu0 }
 0x10e   :  { %v7554_v9 = vpop.f32.mrf.mxu0 }
 0x10f   :  { %v7568_v10 = vpop.f32.mrf.mxu1 }
 0x110   :  { %v216_v11 = vpop.f32.mrf.mxu0  ;;  %v344_v12 = vadd.f32 %v7568_v10, %v7551_v4 }
 0x111   :  { %v337_v13 = vpop.f32.mrf.mxu1 }
 0x112   :  { %v338_v38 = vadd.f32 %v337_v13, %v196_v5 }
 0x113   :  { %v7557_v14 = vpop.f32.mrf.mxu0 }
 0x114   :  { %v7571_v15 = vpop.f32.mrf.mxu1 }
 0x115   :  { %v236_v16 = vpop.f32.mrf.mxu0  ;;  %v356_v42 = vadd.f32 %v7571_v15, %v7554_v9 }
 0x116   :  { %v349_v17 = vpop.f32.mrf.mxu1 }
 0x117   :  { %v7585_v18 = vpop.f32.mrf.mxu0  ;;  %v350_v48 = vadd.f32 %v349_v17, %v216_v11 }
 0x118   :  { %v455_v19 = vadd.f32 %v7585_v18, %v344_v12 }
 0x119   :  { %v7574_v20 = vpop.f32.mrf.mxu1  ;;  %v447_v21 = vpop.f32.mrf.mxu0 }
 0x11a   :  { %v368_v22 = vadd.f32 %v7574_v20, %v7557_v14  ;;  %v448_v43 = vadd.f32 %v447_v21, %v338_v38 }
 0x11b   :  { %v361_v23 = vpop.f32.mrf.mxu1  ;;  %v7588_v24 = vpop.f32.mrf.mxu0 }
 0x11c   :  { %v362_v25 = vadd.f32 %v361_v23, %v236_v16  ;;  %v469_v49 = vadd.f32 %v7588_v24, %v356_v42 }
 0x11d   :  { %v461_v26 = vpop.f32.mrf.mxu0  ;;  %v7602_v27 = vpop.f32.mrf.mxu1 }
 0x11e   :  { %v568_v28 = vadd.f32 %v7602_v27, %v455_v19  ;;  %v462_v53 = vadd.f32 %v461_v26, %v350_v48 }
 0x11f   :  { %v7591_v29 = vpop.f32.mrf.mxu0  ;;  %v559_v30 = vpop.f32.mrf.mxu1 }
 0x120   :  { %v483_v31 = vadd.f32 %v7591_v29, %v368_v22  ;;  %v560_v50 = vadd.f32 %v559_v30, %v448_v43 }
 0x121   :  { %v475_v32 = vpop.f32.mrf.mxu0 }
 0x122   :  { %v476_v33 = vadd.f32 %v475_v32, %v362_v25  ;;  %v7605_v34 = vpop.f32.mrf.mxu1 }
 0x123   :  { %v584_v54 = vadd.f32 %v7605_v34, %v469_v49 }
 0x124   :  { %v575_v35 = vpop.f32.mrf.mxu1 }
 0x125   :  { %v7619_v36 = vpop.f32.mrf.mxu0  ;;  %v576_v59 = vadd.f32 %v575_v35, %v462_v53 }
 0x126   :  { %v689_v39 = vadd.f32 %v7619_v36, %v568_v28 }
 0x127   :  { %v7608_v40 = vpop.f32.mrf.mxu1  ;;  %v682_v41 = vpop.f32.mrf.mxu0 }
 0x128   :  { %v8532_v44 = vadd.f32 %v7608_v40, %v483_v31  ;;  %v683_v55 = vadd.f32 %v682_v41, %v560_v50  ;;  %v840_v40 = vsub.s32 2, %v8492_v6 }
 0x129   :  { %v591_v45 = vpop.f32.mrf.mxu1  ;;  %v7622_v46 = vpop.f32.mrf.mxu0 }
 0x12a   :  { %v8535_v51 = vadd.f32 %v591_v45, %v476_v33  ;;  %v701_v60 = vadd.f32 %v7622_v46, %v584_v54  ;;  %v841_v45 = vrot.slane %v8510_v3, %v840_v40 }
 0x12b   :  { %v7636_v52 = vpop.f32.mrf.mxu1  ;;  %v694_v57 = vpop.f32.mrf.mxu0 }
 0x12c   :  { %v794_v56 = vadd.f32 %v7636_v52, %v689_v39  ;;  %v695_v1 = vadd.f32 %v694_v57, %v576_v59 }
 0x12d   :  { %v787_v58 = vpop.f32.mrf.mxu1 }
 0x12e   :  { %v8537_v61 = vadd.f32 %v825_v47, %v794_v56  ;;  %v788_v62 = vadd.f32 %v787_v58, %v683_v55 }
 0x12f   :  { %v7639_v63 = vpop.f32.mrf.mxu1 }
 0x130   :  { %v8539_v7 = vadd.f32 %v825_v47, %v788_v62  ;;  %v806_v8 = vadd.f32 %v7639_v63, %v701_v60  ;;  %v942_v18 = vsel %vm939_vm1, %v8537_v61, 0 }
 0x131   :  { %v799_v4 = vpop.f32.mrf.mxu1  ;;  %v8565_v20 = vand.u32 4294901760, %v942_v18 }
 0x132   :  { %v837_v5 = vadd.f32 %v834_v0, %v806_v8  ;;  %v800_v9 = vadd.f32 %v799_v4, %v695_v1  ;;  %v940_v10 = vsel %vm939_vm1, %v8539_v7, 0 }
 0x133   :  { %v8543_v11 = vand.u32 4294901760, %v940_v10  ;;  %v1026_v23 = vsub.f32 %v942_v18, %v8565_v20  ;;  %v7625_v18 = vpop.f32.mrf.mxu0 }
 0x134   :  { %v836_v12 = vadd.f32 %v834_v0, %v800_v9  ;;  %866 = vrot.lane.b32.xlu0 %v837_v5, %s8287_s22 }
 0x135   :  { %7654 = vmatprep.mubr.f32.mxu1 %v8543_v11  ;;  %v8548_v13 = vsub.f32 %v940_v10, %v8543_v11  ;;  %v1027_v31 = vand.u32 4294901760, %v1026_v23 }
 0x136   :  { %864 = vrot.lane.b32.xlu1 %v836_v12, %s8287_s22 }
 0x137   :  { %v1017_v14 = vand.u32 4294901760, %v8548_v13  ;;  %v1028_v35 = vsub.f32 %v1026_v23, %v1027_v31 }
 0x138   :  { %868 = vrot.lane.b32.xlu0 %v836_v12, %s8288_s23 }
 0x139   :  { %v1018_v15 = vsub.f32 %v8548_v13, %v1017_v14  ;;  %v1029_v41 = vand.u32 4294901760, %v1028_v35 }
 0x13a   :  { %870 = vrot.lane.b32.xlu1 %v837_v5, %s8288_s23 }
 0x13b   :  { %v1019_v16 = vand.u32 4294901760, %v1018_v15 }
 0x13c   :  { %935 = vrot.lane.b32.xlu0 %v836_v12, %s8289_s24 }
 0x13d   :  { %7647 = vmatprep.mubr.f32.mxu0 %v1019_v16 }
 0x13e   :  { %937 = vrot.lane.b32.xlu1 %v837_v5, %s8289_s24 }
 0x140   :  { %872 = vrot.lane.b32.xlu0 %v836_v12, %s8290_s25 }
 0x142   :  { %874 = vrot.lane.b32.xlu1 %v837_v5, %s8290_s25 }
 0x1a6   :  { %v867_v17 = vpop.permute.xlu0 %866 }
 0x1a7   :  { %1452 = vrot.lane.b32.xlu1 %v867_v17, %s8289_s24 }
 0x1a8   :  { %v865_v19 = vpop.permute.xlu1 %864 }
 0x1a9   :  { %1450 = vrot.lane.b32.xlu0 %v865_v19, %s8289_s24 }
 0x1aa   :  { %v869_v21 = vpop.permute.xlu0 %868 }
 0x1ab   :  { %850 = vrot.lane.b32.xlu1 %v8539_v7, %s8287_s22 }
 0x1ac   :  { %v871_v22 = vpop.permute.xlu1 %870 }
 0x1ad   :  { %852 = vrot.lane.b32.xlu0 %v8537_v61, %s8287_s22 }
 0x1ae   :  { %v936_v24 = vpop.permute.xlu0 %935 }
 0x1af   :  { %v944_v25 = vsel %vm939_vm1, %v936_v24, 0  ;;  %1966 = vrot.lane.b32.xlu1 %v871_v22, %s8289_s24 }
 0x1b0   :  { %v980_v26 = vand.u32 4294901760, %v944_v25  ;;  %v938_v27 = vpop.permute.xlu1 %937 }
 0x1b1   :  { %v946_v28 = vsel %vm939_vm1, %v938_v27, 0  ;;  %1964 = vrot.lane.b32.xlu0 %v869_v21, %s8289_s24  ;;  %v7642_v21 = vpop.f32.mrf.mxu1 }
 0x1b2   :  { %v1072_v29 = vsub.f32 %v944_v25, %v980_v26  ;;  %v977_v30 = vand.u32 4294901760, %v946_v28  ;;  %v873_v37 = vpop.permute.xlu0 %872  ;;  %v706_v25 = vpop.f32.mrf.mxu0 }
 0x1b3   :  { %854 = vrot.lane.b32.xlu1 %v8539_v7, %s8288_s23 }
 0x1b4   :  { %v1065_v32 = vsub.f32 %v946_v28, %v977_v30  ;;  %7643 = vmatprep.subr.mxu0 %v977_v30  ;;  %v1073_v33 = vand.u32 4294901760, %v1072_v29  ;;  %v875_v34 = vpop.permute.xlu1 %874  ;;  %v811_v28 = vpop.f32.mrf.mxu1 }
 0x1b5   :  { %856 = vrot.lane.b32.xlu0 %v8537_v61, %s8288_s23  ;;  %7644 = vmatpush3.xpose.msra.mxu0 %v977_v30 }
 0x1b6   :  { %7645 = vmatprep.subr.mxu0 %v980_v26  ;;  %v1066_v36 = vand.u32 4294901760, %v1065_v32  ;;  %v1074_v39 = vsub.f32 %v1072_v29, %v1073_v33 }
 0x1b7   :  { %2480 = vrot.lane.b32.xlu1 %v875_v34, %s8289_s24 }
 0x1b8   :  { %v1067_v38 = vsub.f32 %v1065_v32, %v1066_v36  ;;  %v1075_v43 = vand.u32 4294901760, %v1074_v39 }
 0x1b9   :  { %2478 = vrot.lane.b32.xlu0 %v873_v37, %s8289_s24  ;;  %7646 = vmatpush3.xpose.msra.mxu0 %v980_v26 }
 0x1ba   :  { %7657 = vmatprep.subr.mxu0 %v1065_v32  ;;  %v1068_v42 = vand.u32 4294901760, %v1067_v38 }
 0x1bb   :  { %858 = vrot.lane.b32.xlu1 %v8539_v7, %s8290_s25 }
 0x1bc   :  { %7648 = vmatmul.mubr.f32.vlgmr.msra.gmra.mxu0 %v1029_v41  ;;  %7650 = vmatprep.subr.mxu1 %v1068_v42 }
 0x1bd   :  { %860 = vrot.lane.b32.xlu0 %v8537_v61, %s8290_s25  ;;  %7651 = vmatpush3.xpose.msra.mxu1 %v1068_v42 }
 0x1be   :  { %7658 = vmatpush3.xpose.msra.mxu0 %v1065_v32  ;;  %7661 = vmatprep.mubr.f32.mxu0 %v8548_v13  ;;  %v713_v32 = vadd.f32 %v7625_v18, %v8532_v44 }
 0x1bf   :  { %7652 = vmatprep.subr.mxu1 %v1075_v43  ;;  %7659 = vmatprep.subr.mxu0 %v1072_v29 }
 0x1c0   :  { %v818_v35 = vadd.f32 %v7642_v21, %v713_v32 }
 0x1c1   :  { %843 = vrot.lane.b32.xlu0 %v841_v45, %s8291_s28  ;;  %7653 = vmatpush3.xpose.msra.mxu1 %v1075_v43 }
 0x1c2   :  { %7660 = vmatpush3.xpose.msra.mxu0 %v1072_v29  ;;  %7664 = vmatprep.subr.mxu1 %v977_v30 }
 0x1c3   :  { %7671 = vmatprep.subr.mxu0 %v1066_v36 }
 0x1c4   :  { %7655 = vmatmul.mubr.f32.vlgmr.msra.gmra.mxu1 %v8565_v20 }
 0x1c5   :  { %7662 = vmatmul.mubr.f32.vlgmr.msra.gmra.mxu0 %v1026_v23  ;;  %7665 = vmatpush3.xpose.msra.mxu1 %v977_v30 }
 0x1c6   :  { %7668 = vmatprep.mubr.f32.mxu1 %v1017_v14  ;;  %7672 = vmatpush3.xpose.msra.mxu0 %v1066_v36 }
 0x1c7   :  { %7675 = vmatprep.mubr.f32.mxu0 %v8543_v11  ;;  %7666 = vmatprep.subr.mxu1 %v980_v26 }
 0x1c8   :  { %7673 = vmatprep.subr.mxu0 %v1073_v33 }
 0x1c9   :  { %7667 = vmatpush3.xpose.msra.mxu1 %v980_v26 }
 0x1ca   :  { %7674 = vmatpush3.xpose.msra.mxu0 %v1073_v33  ;;  %7678 = vmatprep.subr.mxu1 %v977_v30  ;;  %v707_v33 = vadd.f32 %v706_v25, %v8535_v51  ;;  %v892_v25 = vadd.s32 8, %v8492_v6 }
 0x1cc   :  { %7669 = vmatmul.mubr.f32.vlgmr.msra.gmra.mxu1 %v1027_v31  ;;  %v812_v36 = vadd.f32 %v811_v28, %v707_v33  ;;  %v904_v33 = vand.u32 1, %v892_v25 }
 0x1cd   :  { %7676 = vmatmul.mubr.f32.vlgmr.msra.gmra.mxu0 %v8565_v20  ;;  %7679 = vmatpush3.xpose.msra.mxu1 %v977_v30 }
 0x1ce   :  { %7682 = vmatprep.mubr.f32.mxu1 %v8543_v11  ;;  %7680 = vmatprep.subr.mxu1 %v980_v26 }
 0x1d1   :  { %7681 = vmatpush3.xpose.msra.mxu1 %v980_v26 }
 0x1d4   :  { %7683 = vmatmul.mubr.f32.vlgmr.msra.gmra.mxu1 %v8565_v20 }
 0x219   :  { %v1453_v3 = vpop.permute.xlu1 %1452 }
 0x21a   :  { %v1460_v46 = vsel %vm939_vm1, %v1453_v3, 0 }
 0x21b   :  { %v8598_v47 = vand.u32 4294901760, %v1460_v46  ;;  %v1451_v48 = vpop.permute.xlu0 %1450 }
 0x21c   :  { %v1458_v49 = vsel %vm939_vm1, %v1451_v48, 0 }
 0x21d   :  { %v1579_v50 = vsub.f32 %v1460_v46, %v8598_v47  ;;  %v8602_v52 = vand.u32 4294901760, %v1458_v49  ;;  %v851_v53 = vpop.permute.xlu1 %850  ;;  %7685 = vmatprep.subr.mxu0 %v8598_v47 }
 0x21e   :  { %v1454_v54 = vsel %vm939_vm1, %v851_v53, 0  ;;  %7686 = vmatpush3.xpose.msra.mxu0 %v8598_v47 }
 0x21f   :  { %v1586_v55 = vsub.f32 %v1458_v49, %v8602_v52  ;;  %v8608_v56 = vand.u32 4294901760, %v1454_v54  ;;  %v853_v57 = vpop.permute.xlu0 %852  ;;  %7687 = vmatprep.subr.mxu0 %v8602_v52  ;;  %v8611_v58 = vand.u32 4294901760, %v1579_v50 }
 0x220   :  { %v1456_v59 = vsel %vm939_vm1, %v853_v57, 0 }
 0x221   :  { %v1530_v60 = vsub.f32 %v1454_v54, %v8608_v56  ;;  %v8615_v61 = vand.u32 4294901760, %v1456_v59  ;;  %v1967_v62 = vpop.permute.xlu1 %1966  ;;  %7696 = vmatprep.mubr.f32.mxu1 %v8608_v56  ;;  %v1581_v63 = vsub.f32 %v1579_v50, %v8611_v58  ;;  %v8619_v0 = vand.u32 4294901760, %v1586_v55 }
 0x222   :  { %7688 = vmatpush3.xpose.msra.mxu0 %v8602_v52  ;;  %v1974_v17 = vsel %vm939_vm1, %v1967_v62, 0 }
 0x223   :  { %v1531_v1 = vand.u32 4294901760, %v1530_v60  ;;  %v1540_v7 = vsub.f32 %v1456_v59, %v8615_v61  ;;  %v1965_v8 = vpop.permute.xlu0 %1964  ;;  %7699 = vmatprep.subr.mxu0 %v1579_v50  ;;  %v1582_v4 = vand.u32 4294901760, %v1581_v63  ;;  %v1588_v5 = vsub.f32 %v1586_v55, %v8619_v0 }
 0x224   :  { %v8628_v22 = vand.u32 4294901760, %v1974_v17  ;;  %v1972_v24 = vsel %vm939_vm1, %v1965_v8, 0 }
 0x225   :  { %v1541_v9 = vand.u32 4294901760, %v1540_v7  ;;  %v855_v10 = vpop.permute.xlu1 %854  ;;  %7692 = vmatprep.subr.mxu1 %v1582_v4  ;;  %v1532_v11 = vsub.f32 %v1530_v60, %v1531_v1  ;;  %v1589_v12 = vand.u32 4294901760, %v1588_v5  ;;  %v8643_v30 = vand.u32 4294901760, %v1972_v24 }
 0x226   :  { %7693 = vmatpush3.xpose.msra.mxu1 %v1582_v4  ;;  %v1968_v14 = vsel %vm939_vm1, %v855_v10, 0  ;;  %v8641_v29 = vsub.f32 %v1974_v17, %v8628_v22 }
 0x227   :  { %v1542_v13 = vsub.f32 %v1540_v7, %v1541_v9  ;;  %v857_v15 = vpop.permute.xlu0 %856  ;;  %v1533_v16 = vand.u32 4294901760, %v1532_v11  ;;  %7694 = vmatprep.subr.mxu1 %v1589_v12  ;;  %v8626_v20 = vand.u32 4294901760, %v1968_v14  ;;  %v8656_v38 = vsub.f32 %v1972_v24, %v8643_v30 }
 0x228   :  { %v1970_v27 = vsel %vm939_vm1, %v857_v15, 0  ;;  %v8660_v44 = vand.u32 4294901760, %v8641_v29 }
 0x229   :  { %v1543_v19 = vand.u32 4294901760, %v1542_v13  ;;  %7689 = vmatprep.mubr.f32.mxu0 %v1533_v16  ;;  %v8636_v26 = vsub.f32 %v1968_v14, %v8626_v20  ;;  %v8650_v34 = vand.u32 4294901760, %v1970_v27  ;;  %v2481_v42 = vpop.permute.xlu1 %2480  ;;  %v8681_v3 = vand.u32 4294901760, %v8656_v38 }
 0x22a   :  { %7695 = vmatpush3.xpose.msra.mxu1 %v1589_v12  ;;  %v2095_v45 = vsub.f32 %v8641_v29, %v8660_v44 }
 0x22b   :  { %v8630_v23 = vpop.permute.xlu0 %2478  ;;  %7690 = vmatmul.mubr.f32.vlgmr.msra.gmra.mxu0 %v1543_v19  ;;  %7706 = vmatprep.subr.mxu1 %v8598_v47  ;;  %v2045_v37 = vand.u32 4294901760, %v8636_v26  ;;  %v8667_v41 = vsub.f32 %v1970_v27, %v8650_v34  ;;  %v2102_v49 = vsub.f32 %v8656_v38, %v8681_v3 }
 0x22c   :  { %7700 = vmatpush3.xpose.msra.mxu0 %v1579_v50  ;;  %7703 = vmatprep.mubr.f32.mxu0 %v1530_v60  ;;  %v2096_v48 = vand.u32 4294901760, %v2095_v45  ;;  %v2486_v59 = vsel %vm939_vm1, %v8630_v23, 0 }
 0x22d   :  { %7701 = vmatprep.subr.mxu0 %v1586_v55  ;;  %7697 = vmatmul.mubr.f32.vlgmr.msra.gmra.mxu1 %v8615_v61  ;;  %v2046_v43 = vsub.f32 %v8636_v26, %v2045_v37  ;;  %v2055_v46 = vand.u32 4294901760, %v8667_v41  ;;  %v859_v50 = vpop.permute.xlu1 %858  ;;  %v2103_v54 = vand.u32 4294901760, %v2102_v49  ;;  %v8717_v60 = vand.u32 4294901760, %v2486_v59 }
 0x22e   :  { %7707 = vmatpush3.xpose.msra.mxu1 %v8598_v47  ;;  %7710 = vmatprep.mubr.f32.mxu1 %v1531_v1 }
 0x22f   :  { %v8645_v31 = vpop.permute.xlu0 %860  ;;  %7708 = vmatprep.subr.mxu1 %v8602_v52  ;;  %v2056_v53 = vsub.f32 %v8667_v41, %v2055_v46  ;;  %v2614_v1 = vsub.f32 %v2486_v59, %v8717_v60 }
 0x230   :  { %7702 = vmatpush3.xpose.msra.mxu0 %v1586_v55  ;;  %v2488_v55 = vsel %vm939_vm1, %v2481_v42, 0  ;;  %v2484_v62 = vsel %vm939_vm1, %v8645_v31, 0  ;;  %v8292_v42 = vmov -1e+30  }
 0x231   :  { %7713 = vmatprep.subr.mxu0 %v8611_v58 }
 0x232   :  { %7709 = vmatpush3.xpose.msra.mxu1 %v8602_v52 }
 0x233   :  { %7704 = vmatmul.mubr.f32.vlgmr.msra.gmra.mxu0 %v1540_v7  ;;  %v844_v39 = vpop.permute.xlu0 %843  ;;  %7720 = vmatprep.subr.mxu1 %v8598_v47 }
 0x234   :  { %v846_v51 = vadd.f32 %v844_v39, %v812_v36  ;;  %v8662_v40 = vadd.f32 %v844_v39, %v818_v35  ;;  %7714 = vmatpush3.xpose.msra.mxu0 %v8611_v58  ;;  %7717 = vmatprep.mubr.f32.mxu0 %v8608_v56  ;;  %v8709_v58 = vand.u32 4294901760, %v2488_v55 }
 0x235   :  { %7715 = vmatprep.subr.mxu0 %v8619_v0  ;;  %7711 = vmatmul.mubr.f32.vlgmr.msra.gmra.mxu1 %v1541_v9  ;;  %v2615_v9 = vand.u32 4294901760, %v2614_v1 }
 0x236   :  { %880 = vrot.lane.b32.xlu0 %v8662_v40, %s8287_s22  ;;  %7721 = vmatpush3.xpose.msra.mxu1 %v8598_v47  ;;  %v2047_v47 = vand.u32 4294901760, %v2046_v43  ;;  %v2607_v63 = vsub.f32 %v2488_v55, %v8709_v58 }
 0x237   :  { %7724 = vmatprep.mubr.f32.mxu1 %v8608_v56  ;;  %878 = vrot.lane.b32.xlu1 %v846_v51, %s8287_s22  ;;  %v2057_v56 = vand.u32 4294901760, %v2056_v53  ;;  %v2616_v13 = vsub.f32 %v2614_v1, %v2615_v9 }
 0x238   :  { %7716 = vmatpush3.xpose.msra.mxu0 %v8619_v0  ;;  %7722 = vmatprep.subr.mxu1 %v8602_v52  ;;  %v8729_v0 = vand.u32 4294901760, %v2484_v62  ;;  %v2608_v8 = vand.u32 4294901760, %v2607_v63 }
 0x239   :  { %7727 = vmatprep.subr.mxu0 %v8628_v22  ;;  %v2617_v16 = vand.u32 4294901760, %v2616_v13 }
 0x23a   :  { %884 = vrot.lane.b32.xlu0 %v8662_v40, %s8288_s23  ;;  %7723 = vmatpush3.xpose.msra.mxu1 %v8602_v52  ;;  %v2482_v52 = vsel %vm939_vm1, %v859_v50, 0  ;;  %v2568_v4 = vsub.f32 %v2484_v62, %v8729_v0  ;;  %v2609_v10 = vsub.f32 %v2607_v63, %v2608_v8 }
 0x23b   :  { %7718 = vmatmul.mubr.f32.vlgmr.msra.gmra.mxu0 %v8615_v61  ;;  %886 = vrot.lane.b32.xlu1 %v846_v51, %s8290_s25  ;;  %v8705_v57 = vand.u32 4294901760, %v2482_v52 }
 0x23c   :  { %7728 = vmatpush3.xpose.msra.mxu0 %v8628_v22  ;;  %7731 = vmatprep.mubr.f32.mxu0 %v2047_v47  ;;  %v2569_v11 = vand.u32 4294901760, %v2568_v4  ;;  %v2610_v14 = vand.u32 4294901760, %v2609_v10 }
 0x23d   :  { %7734 = vmatprep.subr.mxu1 %v2096_v48  ;;  %7729 = vmatprep.subr.mxu0 %v8643_v30 }
 0x23e   :  { %7725 = vmatmul.mubr.f32.vlgmr.msra.gmra.mxu1 %v8615_v61  ;;  %882 = vrot.lane.b32.xlu0 %v846_v51, %s8288_s23  ;;  %v2558_v61 = vsub.f32 %v2482_v52, %v8705_v57  ;;  %v2570_v15 = vsub.f32 %v2568_v4, %v2569_v11 }
 0x23f   :  { %7735 = vmatpush3.xpose.msra.mxu1 %v2096_v48  ;;  %7738 = vmatprep.mubr.f32.mxu1 %v8626_v20 }
 0x240   :  { %3097 = vrot.lane.b32.xlu1 %v846_v51, %s8291_s28  ;;  %7730 = vmatpush3.xpose.msra.mxu0 %v8643_v30  ;;  %v2559_v7 = vand.u32 4294901760, %v2558_v61  ;;  %v2571_v17 = vand.u32 4294901760, %v2570_v15 }
 0x241   :  { %7736 = vmatprep.subr.mxu1 %v2103_v54  ;;  %7741 = vmatprep.subr.mxu0 %v8641_v29 }
 0x242   :  { %888 = vrot.lane.b32.xlu0 %v8662_v40, %s8290_s25  ;;  %v2560_v5 = vsub.f32 %v2558_v61, %v2559_v7 }
 0x243   :  { %7732 = vmatmul.mubr.f32.vlgmr.msra.gmra.mxu0 %v2057_v56  ;;  %7737 = vmatpush3.xpose.msra.mxu1 %v2103_v54 }
 0x244   :  { %7742 = vmatpush3.xpose.msra.mxu0 %v8641_v29  ;;  %7745 = vmatprep.mubr.f32.mxu0 %v8636_v26  ;;  %v2561_v12 = vand.u32 4294901760, %v2560_v5  ;;  %v918_v26 = vand.u32 127, %v822_v2 }
 0x245   :  { %7748 = vmatprep.subr.mxu1 %v8628_v22  ;;  %7743 = vmatprep.subr.mxu0 %v8656_v38 }
 0x246   :  { %7739 = vmatmul.mubr.f32.vlgmr.msra.gmra.mxu1 %v8650_v34 }
 0x247   :  { %7749 = vmatpush3.xpose.msra.mxu1 %v8628_v22  ;;  %7752 = vmatprep.mubr.f32.mxu1 %v2045_v37  ;;  %v897_v37 = vand.u32 1, %v8492_v6 }
 0x248   :  { %7744 = vmatpush3.xpose.msra.mxu0 %v8656_v38  ;;  %7750 = vmatprep.subr.mxu1 %v8643_v30 }
 0x249   :  { %7755 = vmatprep.subr.mxu0 %v8660_v44 }
 0x24b   :  { %7746 = vmatmul.mubr.f32.vlgmr.msra.gmra.mxu0 %v8667_v41  ;;  %7751 = vmatpush3.xpose.msra.mxu1 %v8643_v30 }
 0x24c   :  { %7756 = vmatpush3.xpose.msra.mxu0 %v8660_v44  ;;  %7759 = vmatprep.mubr.f32.mxu0 %v8626_v20 }
 0x24d   :  { %7762 = vmatprep.subr.mxu1 %v8628_v22  ;;  %7757 = vmatprep.subr.mxu0 %v8681_v3 }
 0x24e   :  { %7753 = vmatmul.mubr.f32.vlgmr.msra.gmra.mxu1 %v2055_v46 }
 0x24f   :  { %7763 = vmatpush3.xpose.msra.mxu1 %v8628_v22  ;;  %7766 = vmatprep.mubr.f32.mxu1 %v8626_v20 }
 0x250   :  { %7758 = vmatpush3.xpose.msra.mxu0 %v8681_v3  ;;  %7764 = vmatprep.subr.mxu1 %v8643_v30 }
 0x251   :  { %7769 = vmatprep.subr.mxu0 %v8709_v58 }
 0x253   :  { %7760 = vmatmul.mubr.f32.vlgmr.msra.gmra.mxu0 %v8650_v34  ;;  %7765 = vmatpush3.xpose.msra.mxu1 %v8643_v30 }
 0x254   :  { %7770 = vmatpush3.xpose.msra.mxu0 %v8709_v58  ;;  %7773 = vmatprep.mubr.f32.mxu0 %v2561_v12 }
 0x255   :  { %7776 = vmatprep.subr.mxu1 %v2610_v14  ;;  %7771 = vmatprep.subr.mxu0 %v8717_v60 }
 0x256   :  { %7767 = vmatmul.mubr.f32.vlgmr.msra.gmra.mxu1 %v8650_v34  ;;  %v923_v34 = vand.u32 1, %v918_v26 }
 0x257   :  { %7777 = vmatpush3.xpose.msra.mxu1 %v2610_v14  ;;  %7780 = vmatprep.mubr.f32.mxu1 %v8705_v57 }
 0x258   :  { %7772 = vmatpush3.xpose.msra.mxu0 %v8717_v60  ;;  %7778 = vmatprep.subr.mxu1 %v2617_v16  ;;  %vm932_vm2 = vcmp.eq.s32.totalorder %v904_v33, %v923_v34  ;;  %vm931_vm3 = vcmp.eq.s32.totalorder %v897_v37, %v923_v34 }
 0x259   :  { %7783 = vmatprep.subr.mxu0 %v2607_v63  ;;  %v8768_v43 = vsel %vm932_vm2, 0.0, %v8292_v42  ;;  %v8770_v46 = vsel %vm931_vm3, 0.0, %v8292_v42 }
 0x25b   :  { %7774 = vmatmul.mubr.f32.vlgmr.msra.gmra.mxu0 %v2571_v17  ;;  %7779 = vmatpush3.xpose.msra.mxu1 %v2617_v16 }
 0x25c   :  { %7784 = vmatpush3.xpose.msra.mxu0 %v2607_v63  ;;  %7787 = vmatprep.mubr.f32.mxu0 %v2558_v61 }
 0x25d   :  { %7790 = vmatprep.subr.mxu1 %v8709_v58  ;;  %7785 = vmatprep.subr.mxu0 %v2614_v1 }
 0x25e   :  { %7781 = vmatmul.mubr.f32.vlgmr.msra.gmra.mxu1 %v8729_v0 }
 0x25f   :  { %7791 = vmatpush3.xpose.msra.mxu1 %v8709_v58  ;;  %7794 = vmatprep.mubr.f32.mxu1 %v2559_v7 }
 0x260   :  { %7786 = vmatpush3.xpose.msra.mxu0 %v2614_v1  ;;  %7792 = vmatprep.subr.mxu1 %v8717_v60 }
 0x261   :  { %7797 = vmatprep.subr.mxu0 %v2608_v8 }
 0x263   :  { %7788 = vmatmul.mubr.f32.vlgmr.msra.gmra.mxu0 %v2568_v4  ;;  %7793 = vmatpush3.xpose.msra.mxu1 %v8717_v60 }
 0x264   :  { %7798 = vmatpush3.xpose.msra.mxu0 %v2608_v8  ;;  %7801 = vmatprep.mubr.f32.mxu0 %v8705_v57 }
 0x265   :  { %7804 = vmatprep.subr.mxu1 %v8709_v58  ;;  %7799 = vmatprep.subr.mxu0 %v2615_v9 }
 0x266   :  { %7795 = vmatmul.mubr.f32.vlgmr.msra.gmra.mxu1 %v2569_v11 }
 0x267   :  { %7805 = vmatpush3.xpose.msra.mxu1 %v8709_v58  ;;  %7808 = vmatprep.mubr.f32.mxu1 %v8705_v57 }
 0x268   :  { %7800 = vmatpush3.xpose.msra.mxu0 %v2615_v9  ;;  %7806 = vmatprep.subr.mxu1 %v8717_v60 }
 0x26b   :  { %7802 = vmatmul.mubr.f32.vlgmr.msra.gmra.mxu0 %v8729_v0  ;;  %7807 = vmatpush3.xpose.msra.mxu1 %v8717_v60 }
 0x26e   :  { %7809 = vmatmul.mubr.f32.vlgmr.msra.gmra.mxu1 %v8729_v0 }
 0x27c   :  { %v7649_v18 = vpop.f32.mrf.mxu0 }
 0x27e   :  { %v1021_v20 = vpop.f32.mrf.mxu0 }
 0x284   :  { %v7656_v19 = vpop.f32.mrf.mxu1 }
 0x285   :  { %v1119_v22 = vadd.f32 %v7656_v19, %v7649_v18  ;;  %v7663_v23 = vpop.f32.mrf.mxu0 }
 0x286   :  { %v1112_v21 = vpop.f32.mrf.mxu1 }
 0x287   :  { %v1113_v24 = vadd.f32 %v1112_v21, %v1021_v20  ;;  %v1202_v28 = vadd.f32 %v7663_v23, %v1119_v22  ;;  %v1194_v29 = vpop.f32.mrf.mxu0 }
 0x289   :  { %v1195_v31 = vadd.f32 %v1194_v29, %v1113_v24 }
 0x28c   :  { %v7670_v27 = vpop.f32.mrf.mxu1 }
 0x28d   :  { %v1285_v32 = vadd.f32 %v7670_v27, %v1202_v28  ;;  %v7677_v35 = vpop.f32.mrf.mxu0 }
 0x28e   :  { %v1276_v30 = vpop.f32.mrf.mxu1 }
 0x28f   :  { %v1277_v36 = vadd.f32 %v1276_v30, %v1195_v31  ;;  %v1368_v38 = vadd.f32 %v7677_v35, %v1285_v32  ;;  %v1361_v39 = vpop.f32.mrf.mxu0 }
 0x291   :  { %v1362_v51 = vadd.f32 %v1361_v39, %v1277_v36 }
 0x294   :  { %v7684_v44 = vpop.f32.mrf.mxu1 }
 0x295   :  { %v1447_v41 = vadd.f32 %v7684_v44, %v1368_v38 }
 0x296   :  { %v1440_v2 = vpop.f32.mrf.mxu1 }
 0x297   :  { %v2993_v45 = vmul.f32 0.35355338, %v1447_v41  ;;  %v1441_v3 = vadd.f32 %v1440_v2, %v1362_v51 }
 0x299   :  { %v2992_v47 = vmul.f32 0.35355338, %v1441_v3  ;;  %v8773_v48 = vadd.f32 %v2993_v45, %v8768_v43 }
 0x29b   :  { %v3012_v49 = vsel %vm3008_vm4, %v8773_v48, -inf  ;;  %v8778_v50 = vadd.f32 %v2992_v47, %v8770_v46 }
 0x29c   :  { %3013 = vmax.xlane.f32.xlu0 %v3012_v49 }
 0x29d   :  { %v3009_v53 = vsel %vm3008_vm4, %v8778_v50, -inf }
 0x29e   :  { %3010 = vmax.xlane.f32.xlu1 %v3009_v53 }
 0x2a8   :  { %v881_v52 = vpop.permute.xlu0 %880 }
 0x2a9   :  { %v8795_v34 = vpop.permute.xlu1 %878 }
 0x2ac   :  { %v8797_v37 = vpop.permute.xlu0 %884 }
 0x2ad   :  { %v8799_v45 = vpop.permute.xlu1 %886 }
 0x2b0   :  { %v8801_v3 = vpop.permute.xlu0 %882 }
 0x2b2   :  { %3099 = vrot.lane.b32.xlu0 %v8662_v40, %s8291_s28 }
 0x2b6   :  { %3613 = vrot.lane.b32.xlu0 %v881_v52, %s8291_s28 }
 0x2eb   :  { %v7691_v54 = vpop.f32.mrf.mxu0 }
 0x2ed   :  { %v7698_v55 = vpop.f32.mrf.mxu1  ;;  %v1535_v56 = vpop.f32.mrf.mxu0 }
 0x2ee   :  { %v1633_v59 = vadd.f32 %v7698_v55, %v7691_v54  ;;  %v3098_v55 = vpop.permute.xlu1 %3097 }
 0x2ef   :  { %v1626_v57 = vpop.f32.mrf.mxu1 }
 0x2f0   :  { %v1627_v62 = vadd.f32 %v1626_v57, %v1535_v56  ;;  %v8811_v57 = vpop.permute.xlu0 %888 }
 0x2f3   :  { %v7705_v58 = vpop.f32.mrf.mxu0 }
 0x2f4   :  { %v1716_v63 = vadd.f32 %v7705_v58, %v1633_v59 }
 0x2f5   :  { %v1708_v60 = vpop.f32.mrf.mxu0  ;;  %v7712_v61 = vpop.f32.mrf.mxu1 }
 0x2f6   :  { %v1709_v0 = vadd.f32 %v1708_v60, %v1627_v62  ;;  %v1799_v7 = vadd.f32 %v7712_v61, %v1716_v63  ;;  %v8815_v61 = vand.u32 4294901760, %v3098_v55 }
 0x2f7   :  { %v1790_v1 = vpop.f32.mrf.mxu1 }
 0x2f8   :  { %v1791_v4 = vadd.f32 %v1790_v1, %v1709_v0 }
 0x2fb   :  { %v7719_v8 = vpop.f32.mrf.mxu0 }
 0x2fc   :  { %v1882_v5 = vadd.f32 %v7719_v8, %v1799_v7 }
 0x2fd   :  { %v1875_v40 = vpop.f32.mrf.mxu0 }
 0x2fe   :  { %v1876_v9 = vadd.f32 %v1875_v40, %v1791_v4  ;;  %v7726_v10 = vpop.f32.mrf.mxu1 }
 0x2ff   :  { %v1961_v11 = vadd.f32 %v7726_v10, %v1882_v5 }
 0x300   :  { %v1954_v12 = vpop.f32.mrf.mxu1 }
 0x301   :  { %v2995_v13 = vmul.f32 0.35355338, %v1961_v11  ;;  %v1955_v14 = vadd.f32 %v1954_v12, %v1876_v9  ;;  %v8819_v9 = vsub.f32 %v3098_v55, %v8815_v61 }
 0x303   :  { %v2994_v15 = vmul.f32 0.35355338, %v1955_v14  ;;  %v8786_v16 = vadd.f32 %v2995_v13, %v8768_v43  ;;  %v7733_v17 = vpop.f32.mrf.mxu0 }
 0x305   :  { %v3018_v18 = vsel %vm3008_vm4, %v8786_v16, -inf  ;;  %v8791_v19 = vadd.f32 %v2994_v15, %v8770_v46  ;;  %v2049_v21 = vpop.f32.mrf.mxu0 }
 0x306   :  { %3019 = vmax.xlane.f32.xlu1 %v3018_v18  ;;  %v7740_v20 = vpop.f32.mrf.mxu1 }
 0x307   :  { %v3015_v22 = vsel %vm3008_vm4, %v8791_v19, -inf  ;;  %v2147_v25 = vadd.f32 %v7740_v20, %v7733_v17 }
 0x308   :  { %v2140_v23 = vpop.f32.mrf.mxu1 }
 0x309   :  { %v2141_v27 = vadd.f32 %v2140_v23, %v2049_v21 }
 0x30a   :  { %3016 = vmax.xlane.f32.xlu1 %v3015_v22  ;;  %v8829_v22 = vand.u32 4294901760, %v8819_v9 }
 0x30b   :  { %v7747_v24 = vpop.f32.mrf.mxu0 }
 0x30c   :  { %v2230_v28 = vadd.f32 %v7747_v24, %v2147_v25 }
 0x30d   :  { %v2222_v26 = vpop.f32.mrf.mxu0 }
 0x30e   :  { %v7754_v29 = vpop.f32.mrf.mxu1  ;;  %v2223_v30 = vadd.f32 %v2222_v26, %v2141_v27 }
 0x30f   :  { %v2313_v32 = vadd.f32 %v7754_v29, %v2230_v28  ;;  %v3235_v29 = vsub.f32 %v8819_v9, %v8829_v22 }
 0x310   :  { %v2304_v31 = vpop.f32.mrf.mxu1 }
 0x311   :  { %v2305_v35 = vadd.f32 %v2304_v31, %v2223_v30 }
 0x313   :  { %v7761_v33 = vpop.f32.mrf.mxu0 }
 0x314   :  { %v2396_v36 = vadd.f32 %v7761_v33, %v2313_v32 }
 0x315   :  { %v2389_v38 = vpop.f32.mrf.mxu0 }
 0x316   :  { %v2390_v39 = vadd.f32 %v2389_v38, %v2305_v35  ;;  %v7768_v44 = vpop.f32.mrf.mxu1  ;;  %v3236_v35 = vand.u32 4294901760, %v3235_v29 }
 0x317   :  { %v2475_v51 = vadd.f32 %v7768_v44, %v2396_v36 }
 0x318   :  { %v2468_v41 = vpop.f32.mrf.mxu1 }
 0x319   :  { %v2997_v2 = vmul.f32 0.35355338, %v2475_v51  ;;  %v2469_v42 = vadd.f32 %v2468_v41, %v2390_v39 }
 0x31b   :  { %v2996_v47 = vmul.f32 0.35355338, %v2469_v42  ;;  %v8804_v49 = vadd.f32 %v2997_v2, %v8768_v43  ;;  %v7775_v53 = vpop.f32.mrf.mxu0 }
 0x31d   :  { %v3024_v52 = vsel %vm3008_vm4, %v8804_v49, -inf  ;;  %v8809_v54 = vadd.f32 %v2996_v47, %v8770_v46  ;;  %v2563_v58 = vpop.f32.mrf.mxu0 }
 0x31e   :  { %3025 = vmax.xlane.f32.xlu1 %v3024_v52  ;;  %v7782_v56 = vpop.f32.mrf.mxu1 }
 0x31f   :  { %v3021_v59 = vsel %vm3008_vm4, %v8809_v54, -inf  ;;  %v2661_v62 = vadd.f32 %v7782_v56, %v7775_v53 }
 0x320   :  { %v2654_v63 = vpop.f32.mrf.mxu1 }
 0x321   :  { %v2655_v4 = vadd.f32 %v2654_v63, %v2563_v58 }
 0x322   :  { %3022 = vmax.xlane.f32.xlu1 %v3021_v59 }
 0x323   :  { %v7789_v60 = vpop.f32.mrf.mxu0 }
 0x324   :  { %v2744_v1 = vadd.f32 %v7789_v60, %v2661_v62 }
 0x325   :  { %v3014_v0 = vpop.xlane.xlu0 %3013  ;;  %v2736_v7 = vpop.f32.mrf.mxu0 }
 0x326   :  { %v3034_v8 = vsub.f32 %v8773_v48, %v3014_v0  ;;  %v7796_v5 = vpop.f32.mrf.mxu1  ;;  %v2737_v12 = vadd.f32 %v2736_v7, %v2655_v4 }
 0x327   :  { %v3011_v40 = vpop.xlane.xlu1 %3010  ;;  %v2827_v14 = vadd.f32 %v7796_v5, %v2744_v1 }
 0x328   :  { %v3043_v10 = vmul.f32 1.442695, %v3034_v8  ;;  %v3033_v11 = vsub.f32 %v8778_v50, %v3011_v40  ;;  %v2818_v18 = vpop.f32.mrf.mxu1 }
 0x329   :  { %v3100_v13 = vpop.permute.xlu0 %3099  ;;  %v2819_v23 = vadd.f32 %v2818_v18, %v2737_v12 }
 0x32a   :  { %8114 = vpow2.f32 %v3043_v10  ;;  %v3041_v15 = vmul.f32 1.442695, %v3033_v11  ;;  %v8822_v17 = vand.u32 4294901760, %v3100_v13 }
 0x32b   :  { %v7803_v20 = vpop.f32.mrf.mxu0 }
 0x32c   :  { %8116 = vpow2.f32 %v3041_v15  ;;  %v8825_v48 = vsub.f32 %v3100_v13, %v8822_v17  ;;  %v2910_v21 = vadd.f32 %v7803_v20, %v2827_v14  ;;  %7811 = vmatprep.subr.mxu0 %v8822_v17 }
 0x32d   :  { %v2903_v50 = vpop.f32.mrf.mxu0  ;;  %7812 = vmatpush3.msra.mxu0 %v8822_v17  ;;  %v3614_v5 = vpop.permute.xlu0 %3613 }
 0x32e   :  { %v7810_v24 = vpop.f32.mrf.mxu1  ;;  %7813 = vmatprep.subr.mxu0 %v8815_v61  ;;  %v8834_v25 = vand.u32 4294901760, %v8825_v48  ;;  %v2904_v26 = vadd.f32 %v2903_v50, %v2819_v23  ;;  %v8876_v13 = vand.u32 4294901760, %v3614_v5 }
 0x32f   :  { %7814 = vmatpush3.msra.mxu0 %v8815_v61  ;;  %v2989_v27 = vadd.f32 %v7810_v24, %v2910_v21 }
 0x330   :  { %7825 = vmatprep.subr.mxu0 %v8825_v48  ;;  %v3228_v28 = vsub.f32 %v8825_v48, %v8834_v25  ;;  %v2982_v30 = vpop.f32.mrf.mxu1  ;;  %v8881_v50 = vsub.f32 %v3614_v5, %v8876_v13 }
 0x331   :  { %v2999_v32 = vmul.f32 0.35355338, %v2989_v27  ;;  %v2983_v33 = vadd.f32 %v2982_v30, %v2904_v26 }
 0x332   :  { %v3229_v31 = vand.u32 4294901760, %v3228_v28 }
 0x333   :  { %v2998_v38 = vmul.f32 0.35355338, %v2983_v33  ;;  %v3007_v44 = vadd.f32 %v2999_v32, %v8768_v43 }
 0x334   :  { %7818 = vmatprep.subr.mxu1 %v3229_v31 }
 0x335   :  { %7819 = vmatpush3.msra.mxu1 %v3229_v31  ;;  %v3030_v2 = vsel %vm3008_vm4, %v3007_v44, -inf  ;;  %v8848_v42 = vadd.f32 %v2998_v38, %v8770_v46  ;;  %v8891_v31 = vand.u32 4294901760, %v8881_v50 }
 0x336   :  { %7820 = vmatprep.subr.mxu1 %v3236_v35 }
 0x337   :  { %v8115_v36 = vpop.eup %8114  ;;  %7821 = vmatpush3.msra.mxu1 %v3236_v35  ;;  %v3027_v47 = vsel %vm3008_vm4, %v8848_v42, -inf }
 0x338   :  { %7832 = vmatprep.subr.mxu1 %v8822_v17  ;;  %v3060_v39 = vsel %vm3008_vm4, %v8115_v36, 0.0 }
 0x339   :  { %v8117_v51 = vpop.eup %8116  ;;  %3061 = vadd.xlane.f32.xlu1 %v3060_v39 }
 0x33a   :  { %v3057_v41 = vsel %vm3008_vm4, %v8117_v51, 0.0 }
 0x33b   :  { %3058 = vadd.xlane.f32.xlu0 %v3057_v41 }
 0x33d   :  { %3031 = vmax.xlane.f32.xlu1 %v3030_v2 }
 0x341   :  { %3028 = vmax.xlane.f32.xlu1 %v3027_v47 }
 0x352   :  { %3611 = vrot.lane.b32.xlu1 %v8795_v34, %s8291_s28 }
 0x38f   :  { %v3020_v53 = vpop.xlane.xlu1 %3019 }
 0x390   :  { %v3036_v43 = vsub.f32 %v8786_v16, %v3020_v53 }
 0x392   :  { %v3047_v52 = vmul.f32 1.442695, %v3036_v43 }
 0x393   :  { %v3017_v55 = vpop.xlane.xlu1 %3016 }
 0x394   :  { %8118 = vpow2.f32 %v3047_v52  ;;  %v3035_v56 = vsub.f32 %v8791_v19, %v3017_v55 }
 0x396   :  { %v3045_v58 = vmul.f32 1.442695, %v3035_v56 }
 0x398   :  { %8120 = vpow2.f32 %v3045_v58 }
 0x3a1   :  { %v8856_v46 = vpop.eup %8118 }
 0x3a2   :  { %v3066_v59 = vsel %vm3008_vm4, %v8856_v46, 0.0 }
 0x3a3   :  { %3067 = vadd.xlane.f32.xlu1 %v3066_v59 }
 0x3a5   :  { %v8860_v60 = vpop.eup %8120 }
 0x3a6   :  { %v3063_v34 = vsel %vm3008_vm4, %v8860_v60, 0.0 }
 0x3a7   :  { %3064 = vadd.xlane.f32.xlu0 %v3063_v34  ;;  %v3026_v16 = vpop.xlane.xlu1 %3025 }
 0x3a8   :  { %v3038_v62 = vsub.f32 %v8804_v49, %v3026_v16 }
 0x3aa   :  { %v3051_v63 = vmul.f32 1.442695, %v3038_v62 }
 0x3ab   :  { %v3023_v0 = vpop.xlane.xlu1 %3022 }
 0x3ac   :  { %8122 = vpow2.f32 %v3051_v63  ;;  %v3037_v19 = vsub.f32 %v8809_v54, %v3023_v0 }
 0x3ae   :  { %v3049_v1 = vmul.f32 1.442695, %v3037_v19 }
 0x3b0   :  { %8124 = vpow2.f32 %v3049_v1 }
 0x3b4   :  { %4125 = vrot.lane.b32.xlu1 %v8801_v3, %s8291_s28 }
 0x3b9   :  { %v8868_v7 = vpop.eup %8122 }
 0x3ba   :  { %v3072_v8 = vsel %vm3008_vm4, %v8868_v7, 0.0 }
 0x3bb   :  { %3073 = vadd.xlane.f32.xlu0 %v3072_v8 }
 0x3bd   :  { %v8872_v4 = vpop.eup %8124 }
 0x3be   :  { %v3069_v49 = vsel %vm3008_vm4, %v8872_v4, 0.0 }
 0x3bf   :  { %3070 = vadd.xlane.f32.xlu0 %v3069_v49 }
 0x3c2   :  { %v3062_v40 = vpop.xlane.xlu1 %3061 }
 0x3c3   :  { %8126 = vrcp.f32 %v3062_v40 }
 0x3c4   :  { %v3059_v54 = vpop.xlane.xlu0 %3058 }
 0x3c5   :  { %8128 = vrcp.f32 %v3059_v54 }
 0x3c6   :  { %v3032_v10 = vpop.xlane.xlu1 %3031 }
 0x3c7   :  { %v3040_v11 = vsub.f32 %v3007_v44, %v3032_v10  ;;  %v3742_v44 = vsub.f32 %v8881_v50, %v8891_v31 }
 0x3c9   :  { %v3055_v3 = vmul.f32 1.442695, %v3040_v11  ;;  %v3743_v53 = vand.u32 4294901760, %v3742_v44 }
 0x3ca   :  { %v3029_v12 = vpop.xlane.xlu1 %3028 }
 0x3cb   :  { %8130 = vpow2.f32 %v3055_v3  ;;  %v3039_v39 = vsub.f32 %v8848_v42, %v3029_v12 }
 0x3cd   :  { %v3053_v47 = vmul.f32 1.442695, %v3039_v39 }
 0x3ce   :  { %v3612_v14 = vpop.permute.xlu1 %3611 }
 0x3cf   :  { %v8878_v21 = vand.u32 4294901760, %v3612_v14  ;;  %8132 = vpow2.f32 %v3053_v47 }
 0x3d0   :  { %v8127_v15 = vpop.eup %8126 }
 0x3d1   :  { %v3084_v18 = vmul.f32 %v8127_v15, %v8115_v36  ;;  %v8888_v28 = vsub.f32 %v3612_v14, %v8878_v21 }
 0x3d2   :  { %v8129_v20 = vpop.eup %8128 }
 0x3d3   :  { %v3082_v23 = vmul.f32 %v8129_v20, %v8117_v51  ;;  %v3107_v24 = vsel %vm3008_vm4, %v3084_v18, 0  ;;  %v8899_v38 = vand.u32 4294901760, %v8888_v28 }
 0x3d4   :  { %v3186_v26 = vand.u32 4294901760, %v3107_v24 }
 0x3d5   :  { %4127 = vrot.lane.b32.xlu0 %v8797_v37, %s8291_s28  ;;  %v3104_v27 = vsel %vm3008_vm4, %v3082_v23, 0  ;;  %v3749_v42 = vsub.f32 %v8888_v28, %v8899_v38 }
 0x3d6   :  { %v3176_v29 = vand.u32 4294901760, %v3104_v27  ;;  %v3187_v30 = vsub.f32 %v3107_v24, %v3186_v26 }
 0x3d7   :  { %v3750_v52 = vand.u32 4294901760, %v3749_v42 }
 0x3d8   :  { %v8893_v32 = vpop.eup %8130  ;;  %7822 = vmatprep.mubr.f32.mxu1 %v3176_v29  ;;  %v3177_v33 = vsub.f32 %v3104_v27, %v3176_v29  ;;  %v3188_v35 = vand.u32 4294901760, %v3187_v30 }
 0x3d9   :  { %7823 = vmatmul.mubr.f32.vlgmr.msra.gmra.mxu1 %v3186_v26  ;;  %v3078_v36 = vsel %vm3008_vm4, %v8893_v32, 0.0 }
 0x3da   :  { %7833 = vmatpush3.msra.mxu1 %v8822_v17  ;;  %3079 = vadd.xlane.f32.xlu1 %v3078_v36  ;;  %v3178_v37 = vand.u32 4294901760, %v3177_v33  ;;  %v3189_v51 = vsub.f32 %v3187_v30, %v3188_v35 }
 0x3db   :  { %7834 = vmatprep.subr.mxu1 %v8815_v61 }
 0x3dc   :  { %7835 = vmatpush3.msra.mxu1 %v8815_v61  ;;  %7836 = vmatprep.mubr.f32.mxu1 %v3178_v37  ;;  %v3179_v41 = vsub.f32 %v3177_v33, %v3178_v37  ;;  %v3190_v43 = vand.u32 4294901760, %v3189_v51 }
 0x3dd   :  { %7846 = vmatprep.subr.mxu1 %v8822_v17  ;;  %7837 = vmatmul.mubr.f32.vlgmr.msra.gmra.mxu1 %v3188_v35 }
 0x3de   :  { %7847 = vmatpush3.msra.mxu1 %v8822_v17  ;;  %7850 = vmatprep.mubr.f32.mxu1 %v3176_v29  ;;  %v3180_v2 = vand.u32 4294901760, %v3179_v41 }
 0x3df   :  { %7848 = vmatprep.subr.mxu1 %v8815_v61 }
 0x3e0   :  { %7849 = vmatpush3.msra.mxu1 %v8815_v61  ;;  %7815 = vmatprep.mubr.f32.mxu0 %v3180_v2  ;;  %v8927_v61 = vpop.eup %8132 }
 0x3e1   :  { %7860 = vmatprep.subr.mxu1 %v3743_v53  ;;  %7816 = vmatmul.mubr.f32.vlgmr.msra.gmra.mxu0 %v3190_v43 }
 0x3e2   :  { %7826 = vmatpush3.msra.mxu0 %v8825_v48  ;;  %7851 = vmatmul.mubr.f32.vlgmr.msra.gmra.mxu1 %v3186_v26 }
 0x3e3   :  { %7861 = vmatpush3.msra.mxu1 %v3743_v53  ;;  %7827 = vmatprep.subr.mxu0 %v8819_v9 }
 0x3e4   :  { %7829 = vmatprep.mubr.f32.mxu0 %v3177_v33  ;;  %7862 = vmatprep.subr.mxu1 %v3750_v52 }
 0x3e5   :  { %7828 = vmatpush3.msra.mxu0 %v8819_v9  ;;  %7863 = vmatpush3.msra.mxu1 %v3750_v52  ;;  %v3075_v9 = vsel %vm3008_vm4, %v8927_v61, 0.0 }
 0x3e6   :  { %7839 = vmatprep.subr.mxu0 %v8834_v25  ;;  %7874 = vmatprep.subr.mxu1 %v8876_v13 }
 0x3e7   :  { %7830 = vmatmul.mubr.f32.vlgmr.msra.gmra.mxu0 %v3187_v30 }
 0x3e8   :  { %7840 = vmatpush3.msra.mxu0 %v8834_v25  ;;  %7843 = vmatprep.mubr.f32.mxu0 %v3176_v29 }
 0x3e9   :  { %7841 = vmatprep.subr.mxu0 %v8829_v22 }
 0x3ea   :  { %7842 = vmatpush3.msra.mxu0 %v8829_v22 }
 0x3eb   :  { %7853 = vmatprep.subr.mxu0 %v8876_v13  ;;  %7844 = vmatmul.mubr.f32.vlgmr.msra.gmra.mxu0 %v3186_v26 }
 0x3ec   :  { %7854 = vmatpush3.msra.mxu0 %v8876_v13  ;;  %4639 = vrot.lane.b32.xlu1 %v8799_v45, %s8291_s28 }
 0x3ed   :  { %7855 = vmatprep.subr.mxu0 %v8878_v21 }
 0x3ee   :  { %7856 = vmatpush3.msra.mxu0 %v8878_v21 }
 0x3ef   :  { %7867 = vmatprep.subr.mxu0 %v8881_v50 }
 0x3f4   :  { %3076 = vadd.xlane.f32.xlu0 %v3075_v9  ;;  %v5153_v9 = vld [vmem:[#allocation10] sm:$0xff] }
 0x40a   :  { %4641 = vrot.lane.b32.xlu0 %v8811_v57, %s8291_s28 }
 0x42c   :  { %v3068_v17 = vpop.xlane.xlu1 %3067 }
 0x42d   :  { %8134 = vrcp.f32 %v3068_v17 }
 0x430   :  { %v3065_v48 = vpop.xlane.xlu0 %3064  ;;  %v4126_v63 = vpop.permute.xlu1 %4125 }
 0x431   :  { %8136 = vrcp.f32 %v3065_v48  ;;  %v8938_v19 = vand.u32 4294901760, %v4126_v63 }
 0x433   :  { %v8945_v5 = vsub.f32 %v4126_v63, %v8938_v19 }
 0x435   :  { %v8952_v3 = vand.u32 4294901760, %v8945_v5 }
 0x437   :  { %v4263_v15 = vsub.f32 %v8945_v5, %v8952_v3 }
 0x439   :  { %v4264_v24 = vand.u32 4294901760, %v4263_v15 }
 0x43a   :  { %v8135_v45 = vpop.eup %8134 }
 0x43b   :  { %v3088_v22 = vmul.f32 %v8135_v45, %v8856_v46 }
 0x43d   :  { %v3621_v25 = vsel %vm3008_vm4, %v3088_v22, 0 }
 0x43e   :  { %v8137_v55 = vpop.eup %8136  ;;  %v3700_v56 = vand.u32 4294901760, %v3621_v25 }
 0x43f   :  { %v3086_v58 = vmul.f32 %v8137_v55, %v8860_v60 }
 0x440   :  { %v3701_v59 = vsub.f32 %v3621_v25, %v3700_v56  ;;  %v8980_v25 = vand.u32 4294901760, %v5153_v9 }
 0x441   :  { %v3618_v34 = vsel %vm3008_vm4, %v3086_v58, 0 }
 0x442   :  { %v3690_v16 = vand.u32 4294901760, %v3618_v34  ;;  %v3702_v62 = vand.u32 4294901760, %v3701_v59 }
 0x444   :  { %v3074_v57 = vpop.xlane.xlu0 %3073  ;;  %7864 = vmatprep.mubr.f32.mxu1 %v3690_v16  ;;  %v3691_v0 = vsub.f32 %v3618_v34, %v3690_v16  ;;  %v3703_v1 = vsub.f32 %v3701_v59, %v3702_v62  ;;  %v8984_v34 = vsub.f32 %v5153_v9, %v8980_v25 }
 0x445   :  { %8138 = vrcp.f32 %v3074_v57  ;;  %7865 = vmatmul.mubr.f32.vlgmr.msra.gmra.mxu1 %v3700_v56 }
 0x446   :  { %7875 = vmatpush3.msra.mxu1 %v8876_v13  ;;  %v3692_v46 = vand.u32 4294901760, %v3691_v0  ;;  %v3704_v40 = vand.u32 4294901760, %v3703_v1  ;;  %v8988_v57 = vand.u32 4294901760, %v8984_v34 }
 0x447   :  { %7876 = vmatprep.subr.mxu1 %v8878_v21 }
 0x448   :  { %7877 = vmatpush3.msra.mxu1 %v8878_v21  ;;  %v3071_v60 = vpop.xlane.xlu0 %3070  ;;  %7878 = vmatprep.mubr.f32.mxu1 %v3692_v46  ;;  %v3693_v8 = vsub.f32 %v3691_v0, %v3692_v46 }
 0x449   :  { %8140 = vrcp.f32 %v3071_v60  ;;  %7888 = vmatprep.subr.mxu1 %v8876_v13  ;;  %7879 = vmatmul.mubr.f32.vlgmr.msra.gmra.mxu1 %v3702_v62 }
 0x44a   :  { %7889 = vmatpush3.msra.mxu1 %v8876_v13  ;;  %7892 = vmatprep.mubr.f32.mxu1 %v3690_v16  ;;  %v3694_v49 = vand.u32 4294901760, %v3693_v8 }
 0x44b   :  { %7890 = vmatprep.subr.mxu1 %v8878_v21 }
 0x44c   :  { %7891 = vmatpush3.msra.mxu1 %v8878_v21  ;;  %v4128_v54 = vpop.permute.xlu0 %4127  ;;  %7857 = vmatprep.mubr.f32.mxu0 %v3694_v49 }
 0x44d   :  { %v4166_v10 = vand.u32 4294901760, %v4128_v54  ;;  %7858 = vmatmul.mubr.f32.vlgmr.msra.gmra.mxu0 %v3704_v40  ;;  %7893 = vmatmul.mubr.f32.vlgmr.msra.gmra.mxu1 %v3700_v56 }
 0x44e   :  { %7868 = vmatpush3.msra.mxu0 %v8881_v50  ;;  %7871 = vmatprep.mubr.f32.mxu0 %v3691_v0 }
 0x44f   :  { %v4254_v11 = vsub.f32 %v4128_v54, %v4166_v10  ;;  %7869 = vmatprep.subr.mxu0 %v8888_v28 }
 0x450   :  { %7870 = vmatpush3.msra.mxu0 %v8888_v28 }
 0x451   :  { %7881 = vmatprep.subr.mxu0 %v8891_v31  ;;  %7872 = vmatmul.mubr.f32.vlgmr.msra.gmra.mxu0 %v3701_v59  ;;  %v4255_v12 = vand.u32 4294901760, %v4254_v11 }
 0x452   :  { %v8139_v13 = vpop.eup %8138  ;;  %7882 = vmatpush3.msra.mxu0 %v8891_v31  ;;  %7885 = vmatprep.mubr.f32.mxu0 %v3690_v16 }
 0x453   :  { %7883 = vmatprep.subr.mxu0 %v8899_v38  ;;  %v4256_v14 = vsub.f32 %v4254_v11, %v4255_v12  ;;  %v3092_v18 = vmul.f32 %v8139_v13, %v8868_v7 }
 0x454   :  { %7884 = vmatpush3.msra.mxu0 %v8899_v38 }
 0x455   :  { %7895 = vmatprep.subr.mxu0 %v4166_v10  ;;  %7886 = vmatmul.mubr.f32.vlgmr.msra.gmra.mxu0 %v3700_v56  ;;  %v4257_v20 = vand.u32 4294901760, %v4256_v14  ;;  %v4135_v21 = vsel %vm3008_vm4, %v3092_v18, 0 }
 0x456   :  { %v8141_v50 = vpop.eup %8140  ;;  %7896 = vmatpush3.msra.mxu0 %v4166_v10  ;;  %v4214_v23 = vand.u32 4294901760, %v4135_v21 }
 0x457   :  { %7897 = vmatprep.subr.mxu0 %v8938_v19  ;;  %7902 = vmatprep.subr.mxu1 %v4257_v20  ;;  %v3090_v26 = vmul.f32 %v8141_v50, %v8872_v4 }
 0x458   :  { %7898 = vmatpush3.msra.mxu0 %v8938_v19  ;;  %7903 = vmatpush3.msra.mxu1 %v4257_v20  ;;  %v4215_v7 = vsub.f32 %v4135_v21, %v4214_v23 }
 0x459   :  { %7909 = vmatprep.subr.mxu0 %v4254_v11  ;;  %7904 = vmatprep.subr.mxu1 %v4264_v24  ;;  %v4132_v27 = vsel %vm3008_vm4, %v3090_v26, 0 }
 0x45a   :  { %7905 = vmatpush3.msra.mxu1 %v4264_v24  ;;  %v4204_v28 = vand.u32 4294901760, %v4132_v27  ;;  %v4216_v29 = vand.u32 4294901760, %v4215_v7 }
 0x45b   :  { %7916 = vmatprep.subr.mxu1 %v4166_v10 }
 0x45c   :  { %7906 = vmatprep.mubr.f32.mxu1 %v4204_v28  ;;  %v4205_v30 = vsub.f32 %v4132_v27, %v4204_v28  ;;  %v4217_v4 = vsub.f32 %v4215_v7, %v4216_v29 }
 0x45d   :  { %7907 = vmatmul.mubr.f32.vlgmr.msra.gmra.mxu1 %v4214_v23 }
 0x45e   :  { %7917 = vmatpush3.msra.mxu1 %v4166_v10  ;;  %v4206_v31 = vand.u32 4294901760, %v4205_v30  ;;  %v4218_v36 = vand.u32 4294901760, %v4217_v4 }
 0x45f   :  { %7918 = vmatprep.subr.mxu1 %v8938_v19 }
 0x460   :  { %7919 = vmatpush3.msra.mxu1 %v8938_v19  ;;  %7920 = vmatprep.mubr.f32.mxu1 %v4206_v31  ;;  %v4207_v33 = vsub.f32 %v4205_v30, %v4206_v31 }
 0x461   :  { %7930 = vmatprep.subr.mxu1 %v4166_v10  ;;  %7921 = vmatmul.mubr.f32.vlgmr.msra.gmra.mxu1 %v4216_v29 }
 0x462   :  { %7931 = vmatpush3.msra.mxu1 %v4166_v10  ;;  %7934 = vmatprep.mubr.f32.mxu1 %v4204_v28  ;;  %v4208_v35 = vand.u32 4294901760, %v4207_v33 }
 0x463   :  { %7932 = vmatprep.subr.mxu1 %v8938_v19  ;;  %v3080_v37 = vpop.xlane.xlu1 %3079 }
 0x464   :  { %7933 = vmatpush3.msra.mxu1 %v8938_v19  ;;  %7899 = vmatprep.mubr.f32.mxu0 %v4208_v35  ;;  %8142 = vrcp.f32 %v3080_v37  ;;  %v5283_v19 = vsub.f32 %v8984_v34, %v8988_v57 }
 0x465   :  { %7900 = vmatmul.mubr.f32.vlgmr.msra.gmra.mxu0 %v4218_v36  ;;  %7935 = vmatmul.mubr.f32.vlgmr.msra.gmra.mxu1 %v4214_v23 }
 0x466   :  { %7910 = vmatpush3.msra.mxu0 %v4254_v11  ;;  %7913 = vmatprep.mubr.f32.mxu0 %v4205_v30  ;;  %v5284_v49 = vand.u32 4294901760, %v5283_v19 }
 0x467   :  { %7911 = vmatprep.subr.mxu0 %v8945_v5  ;;  %v4640_v38 = vpop.permute.xlu1 %4639 }
 0x468   :  { %7912 = vmatpush3.msra.mxu0 %v8945_v5  ;;  %v4683_v39 = vand.u32 4294901760, %v4640_v38 }
 0x469   :  { %7923 = vmatprep.subr.mxu0 %v4255_v12  ;;  %7914 = vmatmul.mubr.f32.vlgmr.msra.gmra.mxu0 %v4215_v7 }
 0x46a   :  { %7924 = vmatpush3.msra.mxu0 %v4255_v12  ;;  %7927 = vmatprep.mubr.f32.mxu0 %v4204_v28  ;;  %v4775_v41 = vsub.f32 %v4640_v38, %v4683_v39 }
 0x46b   :  { %7925 = vmatprep.subr.mxu0 %v8952_v3 }
 0x46c   :  { %7926 = vmatpush3.msra.mxu0 %v8952_v3  ;;  %v8976_v43 = vand.u32 4294901760, %v4775_v41  ;;  %v5154_v3 = vld [vmem:[#allocation10 + $0x8] sm:$0xff] }
 0x46d   :  { %7928 = vmatmul.mubr.f32.vlgmr.msra.gmra.mxu0 %v4214_v23  ;;  %v8998_v20 = vand.u32 4294901760, %v5154_v3 }
 0x46e   :  { %v4777_v45 = vsub.f32 %v4775_v41, %v8976_v43 }
 0x46f   :  { %v9001_v28 = vsub.f32 %v5154_v3, %v8998_v20 }
 0x470   :  { %v4778_v56 = vand.u32 4294901760, %v4777_v45 }
 0x471   :  { %v8143_v51 = vpop.eup %8142  ;;  %v9005_v36 = vand.u32 4294901760, %v9001_v28 }
 0x472   :  { %v3096_v42 = vmul.f32 %v8143_v51, %v8893_v32 }
 0x473   :  { %v5778_v51 = vsub.f32 %v9001_v28, %v9005_v36 }
 0x474   :  { %v4649_v52 = vsel %vm3008_vm4, %v3096_v42, 0 }
 0x475   :  { %v4728_v22 = vand.u32 4294901760, %v4649_v52 }
 0x477   :  { %v4729_v59 = vsub.f32 %v4649_v52, %v4728_v22 }
 0x479   :  { %v4730_v63 = vand.u32 4294901760, %v4729_v59 }
 0x47b   :  { %v4731_v46 = vsub.f32 %v4729_v59, %v4730_v63 }
 0x47d   :  { %v3077_v44 = vpop.xlane.xlu0 %3076  ;;  %v4732_v8 = vand.u32 4294901760, %v4731_v46 }
 0x47e   :  { %8144 = vrcp.f32 %v3077_v44 }
 0x481   :  { %v4642_v2 = vpop.permute.xlu0 %4641 }
 0x482   :  { %v4680_v47 = vand.u32 4294901760, %v4642_v2 }
 0x484   :  { %v4768_v53 = vsub.f32 %v4642_v2, %v4680_v47  ;;  %7937 = vmatprep.subr.mxu0 %v4680_v47 }
 0x485   :  { %7938 = vmatpush3.msra.mxu0 %v4680_v47 }
 0x486   :  { %7939 = vmatprep.subr.mxu0 %v4683_v39  ;;  %v4769_v17 = vand.u32 4294901760, %v4768_v53 }
 0x487   :  { %7940 = vmatpush3.msra.mxu0 %v4683_v39 }
 0x488   :  { %7951 = vmatprep.subr.mxu0 %v4768_v53  ;;  %v4770_v48 = vsub.f32 %v4768_v53, %v4769_v17 }
 0x48a   :  { %v4771_v32 = vand.u32 4294901760, %v4770_v48 }
 0x48b   :  { %v8145_v55 = vpop.eup %8144 }
 0x48c   :  { %7944 = vmatprep.subr.mxu1 %v4771_v32  ;;  %v3094_v58 = vmul.f32 %v8145_v55, %v8927_v61 }
 0x48d   :  { %7945 = vmatpush3.msra.mxu1 %v4771_v32  ;;  %v5155_v32 = vld [vmem:[#allocation10 + $0x10] sm:$0xff] }
 0x48e   :  { %7946 = vmatprep.subr.mxu1 %v4778_v56  ;;  %v4646_v16 = vsel %vm3008_vm4, %v3094_v58, 0 }
 0x48f   :  { %7947 = vmatpush3.msra.mxu1 %v4778_v56  ;;  %v4718_v62 = vand.u32 4294901760, %v4646_v16 }
 0x490   :  { %7958 = vmatprep.subr.mxu1 %v4680_v47 }
 0x491   :  { %7948 = vmatprep.mubr.f32.mxu1 %v4718_v62  ;;  %v4719_v0 = vsub.f32 %v4646_v16, %v4718_v62  ;;  %v9020_v16 = vand.u32 4294901760, %v5155_v32 }
 0x492   :  { %7949 = vmatmul.mubr.f32.vlgmr.msra.gmra.mxu1 %v4728_v22 }
 0x493   :  { %7959 = vmatpush3.msra.mxu1 %v4680_v47  ;;  %v4720_v61 = vand.u32 4294901760, %v4719_v0 }
 0x494   :  { %7960 = vmatprep.subr.mxu1 %v4683_v39 }
 0x495   :  { %7961 = vmatpush3.msra.mxu1 %v4683_v39  ;;  %7962 = vmatprep.mubr.f32.mxu1 %v4720_v61  ;;  %v4721_v1 = vsub.f32 %v4719_v0, %v4720_v61 }
 0x496   :  { %7972 = vmatprep.subr.mxu1 %v4680_v47  ;;  %7963 = vmatmul.mubr.f32.vlgmr.msra.gmra.mxu1 %v4730_v63 }
 0x497   :  { %7973 = vmatpush3.msra.mxu1 %v4680_v47  ;;  %7976 = vmatprep.mubr.f32.mxu1 %v4718_v62  ;;  %v4722_v60 = vand.u32 4294901760, %v4721_v1  ;;  %v9023_v1 = vsub.f32 %v5155_v32, %v9020_v16 }
 0x498   :  { %7974 = vmatprep.subr.mxu1 %v4683_v39 }
 0x499   :  { %7975 = vmatpush3.msra.mxu1 %v4683_v39  ;;  %7941 = vmatprep.mubr.f32.mxu0 %v4722_v60  ;;  %v7824_v5 = vpop.f32.mrf.mxu1 }
 0x49a   :  { %7942 = vmatmul.mubr.f32.vlgmr.msra.gmra.mxu0 %v4732_v8  ;;  %7977 = vmatmul.mubr.f32.vlgmr.msra.gmra.mxu1 %v4728_v22 }
 0x49b   :  { %7952 = vmatpush3.msra.mxu0 %v4768_v53  ;;  %7955 = vmatprep.mubr.f32.mxu0 %v4719_v0  ;;  %v3273_v40 = vpop.f32.mrf.mxu1  ;;  %v5779_v53 = vand.u32 4294901760, %v5778_v51 }
 0x49c   :  { %7953 = vmatprep.subr.mxu0 %v4775_v41  ;;  %7984 = vmatprep.subr.mxu1 %v5284_v49 }
 0x49d   :  { %7954 = vmatpush3.msra.mxu0 %v4775_v41  ;;  %7985 = vmatpush3.msra.mxu1 %v5284_v49  ;;  %v7838_v10 = vpop.f32.mrf.mxu1 }
 0x49e   :  { %7965 = vmatprep.subr.mxu0 %v4769_v17  ;;  %7956 = vmatmul.mubr.f32.vlgmr.msra.gmra.mxu0 %v4729_v59 }
 0x49f   :  { %7966 = vmatpush3.msra.mxu0 %v4769_v17  ;;  %7969 = vmatprep.mubr.f32.mxu0 %v4718_v62  ;;  %v3437_v13 = vpop.f32.mrf.mxu1 }
 0x4a0   :  { %7967 = vmatprep.subr.mxu0 %v8976_v43  ;;  %7994 = vmatprep.subr.mxu1 %v8980_v25 }
 0x4a1   :  { %7968 = vmatpush3.msra.mxu0 %v8976_v43  ;;  %v7817_v54 = vpop.f32.mrf.mxu0 }
 0x4a2   :  { %7970 = vmatmul.mubr.f32.vlgmr.msra.gmra.mxu0 %v4728_v22  ;;  %7979 = vmatprep.subr.mxu0 %v8980_v25  ;;  %v3280_v12 = vadd.f32 %v7824_v5, %v7817_v54  ;;  %v7852_v24 = vpop.f32.mrf.mxu1 }
 0x4a3   :  { %v3182_v11 = vpop.f32.mrf.mxu0  ;;  %7980 = vmatpush3.msra.mxu0 %v8980_v25 }
 0x4a4   :  { %7989 = vmatprep.subr.mxu0 %v8984_v34  ;;  %v3274_v15 = vadd.f32 %v3273_v40, %v3182_v11  ;;  %v3601_v4 = vpop.f32.mrf.mxu1 }
 0x4a7   :  { %v7831_v14 = vpop.f32.mrf.mxu0 }
 0x4a8   :  { %v3363_v18 = vadd.f32 %v7831_v14, %v3280_v12 }
 0x4a9   :  { %v3355_v21 = vpop.f32.mrf.mxu0 }
 0x4aa   :  { %v3356_v50 = vadd.f32 %v3355_v21, %v3274_v15  ;;  %v3446_v23 = vadd.f32 %v7838_v10, %v3363_v18  ;;  %v9027_v10 = vand.u32 4294901760, %v9023_v1 }
 0x4ab   :  { %v7845_v26 = vpop.f32.mrf.mxu0 }
 0x4ac   :  { %v3529_v7 = vadd.f32 %v7845_v26, %v3446_v23  ;;  %v3438_v27 = vadd.f32 %v3437_v13, %v3356_v50  ;;  %v6273_v15 = vsub.f32 %v9023_v1, %v9027_v10 }
 0x4ad   :  { %v3522_v29 = vpop.f32.mrf.mxu0 }
 0x4ae   :  { %v3608_v30 = vadd.f32 %v7852_v24, %v3529_v7  ;;  %v3523_v31 = vadd.f32 %v3522_v29, %v3438_v27  ;;  %v6274_v26 = vand.u32 4294901760, %v6273_v15 }
 0x4b0   :  { %v5161_v33 = vsel %vm939_vm1, %v3608_v30, 0  ;;  %v3602_v35 = vadd.f32 %v3601_v4, %v3523_v31 }
 0x4b1   :  { %v5239_v37 = vand.u32 4294901760, %v5161_v33 }
 0x4b2   :  { %v5158_v38 = vsel %vm939_vm1, %v3602_v35, 0 }
 0x4b3   :  { %v5240_v39 = vsub.f32 %v5161_v33, %v5239_v37  ;;  %v5229_v44 = vand.u32 4294901760, %v5158_v38  ;;  %v5156_v33 = vld [vmem:[#allocation10 + $0x18] sm:$0xff] }
 0x4b4   :  { %v9037_v51 = vand.u32 4294901760, %v5156_v33 }
 0x4b5   :  { %v5230_v41 = vsub.f32 %v5158_v38, %v5229_v44  ;;  %7986 = vmatprep.mubr.f32.mxu1 %v5229_v44  ;;  %v5241_v2 = vand.u32 4294901760, %v5240_v39 }
 0x4b6   :  { %7987 = vmatmul.mubr.f32.vlgmr.msra.gmra.mxu1 %v5239_v37 }
 0x4b7   :  { %7995 = vmatpush3.msra.mxu1 %v8980_v25  ;;  %v5231_v42 = vand.u32 4294901760, %v5230_v41  ;;  %v5242_v47 = vsub.f32 %v5240_v39, %v5241_v2 }
 0x4b8   :  { %8004 = vmatprep.subr.mxu1 %v8980_v25 }
 0x4b9   :  { %7996 = vmatprep.mubr.f32.mxu1 %v5231_v42  ;;  %v5232_v43 = vsub.f32 %v5230_v41, %v5231_v42  ;;  %v5243_v9 = vand.u32 4294901760, %v5242_v47 }
 0x4ba   :  { %7997 = vmatmul.mubr.f32.vlgmr.msra.gmra.mxu1 %v5241_v2 }
 0x4bb   :  { %8006 = vmatprep.mubr.f32.mxu1 %v5229_v44  ;;  %v5233_v52 = vand.u32 4294901760, %v5232_v43  ;;  %8005 = vmatpush3.msra.mxu1 %v8980_v25  ;;  %v9043_v43 = vsub.f32 %v5156_v33, %v9037_v51 }
 0x4bc   :  { %8014 = vmatprep.subr.mxu1 %v5779_v53 }
 0x4bd   :  { %7981 = vmatprep.mubr.f32.mxu0 %v5233_v52 }
 0x4be   :  { %7982 = vmatmul.mubr.f32.vlgmr.msra.gmra.mxu0 %v5243_v9  ;;  %8007 = vmatmul.mubr.f32.vlgmr.msra.gmra.mxu1 %v5239_v37 }
 0x4bf   :  { %7991 = vmatprep.mubr.f32.mxu0 %v5230_v41  ;;  %7990 = vmatpush3.msra.mxu0 %v8984_v34 }
 0x4c0   :  { %7999 = vmatprep.subr.mxu0 %v8988_v57  ;;  %8015 = vmatpush3.msra.mxu1 %v5779_v53 }
 0x4c1   :  { %8024 = vmatprep.subr.mxu1 %v8998_v20 }
 0x4c2   :  { %7992 = vmatmul.mubr.f32.vlgmr.msra.gmra.mxu0 %v5240_v39 }
 0x4c3   :  { %8001 = vmatprep.mubr.f32.mxu0 %v5229_v44  ;;  %8000 = vmatpush3.msra.mxu0 %v8988_v57 }
 0x4c4   :  { %8009 = vmatprep.subr.mxu0 %v8998_v20 }
 0x4c6   :  { %8002 = vmatmul.mubr.f32.vlgmr.msra.gmra.mxu0 %v5239_v37 }
 0x4c7   :  { %8010 = vmatpush3.msra.mxu0 %v8998_v20 }
 0x4c8   :  { %8019 = vmatprep.subr.mxu0 %v9001_v28 }
 0x505   :  { %v7866_v17 = vpop.f32.mrf.mxu1 }
 0x507   :  { %v3787_v48 = vpop.f32.mrf.mxu1 }
 0x509   :  { %v7880_v45 = vpop.f32.mrf.mxu1 }
 0x50b   :  { %v3951_v56 = vpop.f32.mrf.mxu1 }
 0x50d   :  { %v7859_v22 = vpop.f32.mrf.mxu0  ;;  %v7894_v0 = vpop.f32.mrf.mxu1 }
 0x50e   :  { %v3794_v55 = vadd.f32 %v7866_v17, %v7859_v22 }
 0x50f   :  { %v3696_v25 = vpop.f32.mrf.mxu0  ;;  %v4115_v5 = vpop.f32.mrf.mxu1 }
 0x510   :  { %v3788_v59 = vadd.f32 %v3787_v48, %v3696_v25 }
 0x511   :  { %v7873_v58 = vpop.f32.mrf.mxu0 }
 0x512   :  { %v3877_v34 = vadd.f32 %v7873_v58, %v3794_v55 }
 0x513   :  { %v3869_v62 = vpop.f32.mrf.mxu0 }
 0x514   :  { %v3870_v63 = vadd.f32 %v3869_v62, %v3788_v59  ;;  %v3960_v57 = vadd.f32 %v7880_v45, %v3877_v34 }
 0x515   :  { %v7887_v61 = vpop.f32.mrf.mxu0 }
 0x516   :  { %v4043_v46 = vadd.f32 %v7887_v61, %v3960_v57  ;;  %v3952_v19 = vadd.f32 %v3951_v56, %v3870_v63 }
 0x517   :  { %v4036_v60 = vpop.f32.mrf.mxu0 }
 0x518   :  { %v4122_v8 = vadd.f32 %v7894_v0, %v4043_v46  ;;  %v4037_v49 = vadd.f32 %v4036_v60, %v3952_v19 }
 0x51a   :  { %v5656_v40 = vsel %vm939_vm1, %v4122_v8, 0  ;;  %v4116_v54 = vadd.f32 %v4115_v5, %v4037_v49 }
 0x51b   :  { %v5734_v11 = vand.u32 4294901760, %v5656_v40 }
 0x51c   :  { %v5653_v3 = vsel %vm939_vm1, %v4116_v54, 0 }
 0x51d   :  { %v5735_v12 = vsub.f32 %v5656_v40, %v5734_v11  ;;  %v5724_v13 = vand.u32 4294901760, %v5653_v3  ;;  %v7908_v14 = vpop.f32.mrf.mxu1 }
 0x51f   :  { %v5725_v18 = vsub.f32 %v5653_v3, %v5724_v13  ;;  %8016 = vmatprep.mubr.f32.mxu1 %v5724_v13  ;;  %v5736_v21 = vand.u32 4294901760, %v5735_v12  ;;  %v4301_v50 = vpop.f32.mrf.mxu1 }
 0x520   :  { %8017 = vmatmul.mubr.f32.vlgmr.msra.gmra.mxu1 %v5734_v11 }
 0x521   :  { %8025 = vmatpush3.msra.mxu1 %v8998_v20  ;;  %v5726_v23 = vand.u32 4294901760, %v5725_v18  ;;  %v5737_v24 = vsub.f32 %v5735_v12, %v5736_v21  ;;  %v7922_v27 = vpop.f32.mrf.mxu1 }
 0x522   :  { %8034 = vmatprep.subr.mxu1 %v8998_v20 }
 0x523   :  { %8026 = vmatprep.mubr.f32.mxu1 %v5726_v23  ;;  %v5727_v7 = vsub.f32 %v5725_v18, %v5726_v23  ;;  %v5738_v31 = vand.u32 4294901760, %v5737_v24  ;;  %v4465_v37 = vpop.f32.mrf.mxu1 }
 0x524   :  { %8027 = vmatmul.mubr.f32.vlgmr.msra.gmra.mxu1 %v5736_v21 }
 0x525   :  { %v7901_v29 = vpop.f32.mrf.mxu0  ;;  %8036 = vmatprep.mubr.f32.mxu1 %v5724_v13  ;;  %v5728_v30 = vand.u32 4294901760, %v5727_v7  ;;  %8035 = vmatpush3.msra.mxu1 %v8998_v20  ;;  %v7936_v42 = vpop.f32.mrf.mxu1 }
 0x526   :  { %8044 = vmatprep.subr.mxu1 %v6274_v26  ;;  %v4308_v35 = vadd.f32 %v7908_v14, %v7901_v29 }
 0x527   :  { %v4210_v4 = vpop.f32.mrf.mxu0  ;;  %8011 = vmatprep.mubr.f32.mxu0 %v5728_v30  ;;  %v4629_v48 = vpop.f32.mrf.mxu1 }
 0x528   :  { %8012 = vmatmul.mubr.f32.vlgmr.msra.gmra.mxu0 %v5738_v31  ;;  %8037 = vmatmul.mubr.f32.vlgmr.msra.gmra.mxu1 %v5734_v11  ;;  %v4302_v39 = vadd.f32 %v4301_v50, %v4210_v4 }
 0x529   :  { %v7915_v38 = vpop.f32.mrf.mxu0  ;;  %8021 = vmatprep.mubr.f32.mxu0 %v5725_v18  ;;  %8020 = vmatpush3.msra.mxu0 %v9001_v28 }
 0x52a   :  { %v4391_v44 = vadd.f32 %v7915_v38, %v4308_v35  ;;  %8029 = vmatprep.subr.mxu0 %v9005_v36  ;;  %8045 = vmatpush3.msra.mxu1 %v6274_v26 }
 0x52b   :  { %v4383_v20 = vpop.f32.mrf.mxu0  ;;  %8054 = vmatprep.subr.mxu1 %v9020_v16 }
 0x52c   :  { %v4384_v41 = vadd.f32 %v4383_v20, %v4302_v39  ;;  %8022 = vmatmul.mubr.f32.vlgmr.msra.gmra.mxu0 %v5735_v12  ;;  %v4474_v2 = vadd.f32 %v7922_v27, %v4391_v44 }
 0x52d   :  { %v7929_v47 = vpop.f32.mrf.mxu0  ;;  %8031 = vmatprep.mubr.f32.mxu0 %v5724_v13  ;;  %8030 = vmatpush3.msra.mxu0 %v9005_v36  ;;  %v9049_v36 = vand.u32 4294901760, %v9043_v43 }
 0x52e   :  { %v4557_v53 = vadd.f32 %v7929_v47, %v4474_v2  ;;  %v4466_v28 = vadd.f32 %v4465_v37, %v4384_v41  ;;  %8039 = vmatprep.subr.mxu0 %v9020_v16 }
 0x52f   :  { %v4550_v52 = vpop.f32.mrf.mxu0  ;;  %v6768_v58 = vsub.f32 %v9043_v43, %v9049_v36 }
 0x530   :  { %v4636_v9 = vadd.f32 %v7936_v42, %v4557_v53  ;;  %v4551_v17 = vadd.f32 %v4550_v52, %v4466_v28  ;;  %8032 = vmatmul.mubr.f32.vlgmr.msra.gmra.mxu0 %v5734_v11 }
 0x531   :  { %8040 = vmatpush3.msra.mxu0 %v9020_v16  ;;  %v6769_v57 = vand.u32 4294901760, %v6768_v58 }
 0x532   :  { %v6151_v45 = vsel %vm939_vm1, %v4636_v9, 0  ;;  %v4630_v22 = vadd.f32 %v4629_v48, %v4551_v17  ;;  %8049 = vmatprep.subr.mxu0 %v9023_v1 }
 0x533   :  { %v6229_v25 = vand.u32 4294901760, %v6151_v45 }
 0x534   :  { %v6148_v32 = vsel %vm939_vm1, %v4630_v22, 0 }
 0x535   :  { %v6230_v55 = vsub.f32 %v6151_v45, %v6229_v25  ;;  %v6219_v56 = vand.u32 4294901760, %v6148_v32 }
 0x537   :  { %v6220_v59 = vsub.f32 %v6148_v32, %v6219_v56  ;;  %8046 = vmatprep.mubr.f32.mxu1 %v6219_v56  ;;  %v6231_v34 = vand.u32 4294901760, %v6230_v55 }
 0x538   :  { %8047 = vmatmul.mubr.f32.vlgmr.msra.gmra.mxu1 %v6229_v25 }
 0x539   :  { %8055 = vmatpush3.msra.mxu1 %v9020_v16  ;;  %v6221_v62 = vand.u32 4294901760, %v6220_v59  ;;  %v6232_v63 = vsub.f32 %v6230_v55, %v6231_v34 }
 0x53a   :  { %8064 = vmatprep.subr.mxu1 %v9020_v16 }
 0x53b   :  { %8056 = vmatprep.mubr.f32.mxu1 %v6221_v62  ;;  %v6222_v0 = vsub.f32 %v6220_v59, %v6221_v62  ;;  %v6233_v46 = vand.u32 4294901760, %v6232_v63 }
 0x53c   :  { %8057 = vmatmul.mubr.f32.vlgmr.msra.gmra.mxu1 %v6231_v34 }
 0x53d   :  { %8066 = vmatprep.mubr.f32.mxu1 %v6219_v56  ;;  %v6223_v61 = vand.u32 4294901760, %v6222_v0  ;;  %8065 = vmatpush3.msra.mxu1 %v9020_v16 }
 0x53e   :  { %8074 = vmatprep.subr.mxu1 %v6769_v57 }
 0x53f   :  { %8041 = vmatprep.mubr.f32.mxu0 %v6223_v61 }
 0x540   :  { %8042 = vmatmul.mubr.f32.vlgmr.msra.gmra.mxu0 %v6233_v46  ;;  %8067 = vmatmul.mubr.f32.vlgmr.msra.gmra.mxu1 %v6229_v25 }
 0x541   :  { %8051 = vmatprep.mubr.f32.mxu0 %v6220_v59  ;;  %8050 = vmatpush3.msra.mxu0 %v9023_v1 }
 0x542   :  { %8059 = vmatprep.subr.mxu0 %v9027_v10  ;;  %8075 = vmatpush3.msra.mxu1 %v6769_v57 }
 0x543   :  { %8084 = vmatprep.subr.mxu1 %v9037_v51 }
 0x544   :  { %8052 = vmatmul.mubr.f32.vlgmr.msra.gmra.mxu0 %v6230_v55 }
 0x545   :  { %8061 = vmatprep.mubr.f32.mxu0 %v6219_v56  ;;  %8060 = vmatpush3.msra.mxu0 %v9027_v10 }
 0x546   :  { %8069 = vmatprep.subr.mxu0 %v9037_v51 }
 0x548   :  { %8062 = vmatmul.mubr.f32.vlgmr.msra.gmra.mxu0 %v6229_v25 }
 0x549   :  { %8070 = vmatpush3.msra.mxu0 %v9037_v51 }
 0x54a   :  { %8079 = vmatprep.subr.mxu0 %v9043_v43 }
 0x552   :  { %v7950_v16 = vpop.f32.mrf.mxu1 }
 0x554   :  { %v4815_v19 = vpop.f32.mrf.mxu1 }
 0x556   :  { %v7964_v60 = vpop.f32.mrf.mxu1 }
 0x558   :  { %v4979_v5 = vpop.f32.mrf.mxu1 }
 0x55a   :  { %v7943_v1 = vpop.f32.mrf.mxu0  ;;  %v7978_v13 = vpop.f32.mrf.mxu1 }
 0x55b   :  { %v4822_v49 = vadd.f32 %v7950_v16, %v7943_v1 }
 0x55c   :  { %v4724_v8 = vpop.f32.mrf.mxu0  ;;  %v5143_v24 = vpop.f32.mrf.mxu1 }
 0x55d   :  { %v4816_v54 = vadd.f32 %v4815_v19, %v4724_v8 }
 0x55e   :  { %v7957_v40 = vpop.f32.mrf.mxu0 }
 0x55f   :  { %v4905_v11 = vadd.f32 %v7957_v40, %v4822_v49 }
 0x560   :  { %v4897_v3 = vpop.f32.mrf.mxu0 }
 0x561   :  { %v4898_v12 = vadd.f32 %v4897_v3, %v4816_v54  ;;  %v4988_v10 = vadd.f32 %v7964_v60, %v4905_v11 }
 0x562   :  { %v7971_v14 = vpop.f32.mrf.mxu0 }
 0x563   :  { %v5071_v15 = vadd.f32 %v7971_v14, %v4988_v10  ;;  %v4980_v18 = vadd.f32 %v4979_v5, %v4898_v12 }
 0x564   :  { %v5064_v21 = vpop.f32.mrf.mxu0 }
 0x565   :  { %v5150_v50 = vadd.f32 %v7978_v13, %v5071_v15  ;;  %v5065_v23 = vadd.f32 %v5064_v21, %v4980_v18 }
 0x567   :  { %v6646_v26 = vsel %vm939_vm1, %v5150_v50, 0  ;;  %v5144_v7 = vadd.f32 %v5143_v24, %v5065_v23 }
 0x568   :  { %v6724_v27 = vand.u32 4294901760, %v6646_v26 }
 0x569   :  { %v6643_v29 = vsel %vm939_vm1, %v5144_v7, 0 }
 0x56a   :  { %v6725_v30 = vsub.f32 %v6646_v26, %v6724_v27  ;;  %v6714_v31 = vand.u32 4294901760, %v6643_v29 }
 0x56c   :  { %v6715_v4 = vsub.f32 %v6643_v29, %v6714_v31  ;;  %8076 = vmatprep.mubr.f32.mxu1 %v6714_v31  ;;  %v6726_v33 = vand.u32 4294901760, %v6725_v30 }
 0x56d   :  { %8077 = vmatmul.mubr.f32.vlgmr.msra.gmra.mxu1 %v6724_v27 }
 0x56e   :  { %8085 = vmatpush3.msra.mxu1 %v9037_v51  ;;  %v6716_v35 = vand.u32 4294901760, %v6715_v4  ;;  %v6727_v37 = vsub.f32 %v6725_v30, %v6726_v33 }
 0x56f   :  { %8094 = vmatprep.subr.mxu1 %v9037_v51 }
 0x570   :  { %8086 = vmatprep.mubr.f32.mxu1 %v6716_v35  ;;  %v6717_v38 = vsub.f32 %v6715_v4, %v6716_v35  ;;  %v6728_v44 = vand.u32 4294901760, %v6727_v37 }
 0x571   :  { %8087 = vmatmul.mubr.f32.vlgmr.msra.gmra.mxu1 %v6726_v33 }
 0x572   :  { %8096 = vmatprep.mubr.f32.mxu1 %v6714_v31  ;;  %v6718_v39 = vand.u32 4294901760, %v6717_v38  ;;  %8095 = vmatpush3.msra.mxu1 %v9037_v51 }
 0x574   :  { %8071 = vmatprep.mubr.f32.mxu0 %v6718_v39 }
 0x575   :  { %8072 = vmatmul.mubr.f32.vlgmr.msra.gmra.mxu0 %v6728_v44  ;;  %8097 = vmatmul.mubr.f32.vlgmr.msra.gmra.mxu1 %v6724_v27 }
 0x576   :  { %8080 = vmatpush3.msra.mxu0 %v9043_v43  ;;  %8081 = vmatprep.mubr.f32.mxu0 %v6715_v4  ;;  %v7988_v20 = vpop.f32.mrf.mxu1 }
 0x577   :  { %8089 = vmatprep.subr.mxu0 %v9049_v36 }
 0x578   :  { %v5321_v41 = vpop.f32.mrf.mxu1 }
 0x579   :  { %8082 = vmatmul.mubr.f32.vlgmr.msra.gmra.mxu0 %v6725_v30 }
 0x57a   :  { %8090 = vmatpush3.msra.mxu0 %v9049_v36  ;;  %8091 = vmatprep.mubr.f32.mxu0 %v6714_v31  ;;  %v7998_v2 = vpop.f32.mrf.mxu1 }
 0x57c   :  { %v5482_v47 = vpop.f32.mrf.mxu1 }
 0x57d   :  { %8092 = vmatmul.mubr.f32.vlgmr.msra.gmra.mxu0 %v6724_v27 }
 0x57e   :  { %v7983_v42 = vpop.f32.mrf.mxu0  ;;  %v8008_v53 = vpop.f32.mrf.mxu1 }
 0x57f   :  { %v5328_v8 = vadd.f32 %v7988_v20, %v7983_v42 }
 0x580   :  { %v5235_v51 = vpop.f32.mrf.mxu0  ;;  %v9072_v52 = vpop.f32.mrf.mxu1 }
 0x581   :  { %v5322_v3 = vadd.f32 %v5321_v41, %v5235_v51 }
 0x582   :  { %v7993_v28 = vpop.f32.mrf.mxu0 }
 0x583   :  { %v5409_v12 = vadd.f32 %v7993_v28, %v5328_v8 }
 0x584   :  { %v5401_v9 = vpop.f32.mrf.mxu0 }
 0x585   :  { %v5402_v18 = vadd.f32 %v5401_v9, %v5322_v3  ;;  %v5491_v24 = vadd.f32 %v7998_v2, %v5409_v12 }
 0x586   :  { %v8003_v17 = vpop.f32.mrf.mxu0 }
 0x587   :  { %v5483_v29 = vadd.f32 %v5482_v47, %v5402_v18  ;;  %v5571_v33 = vadd.f32 %v8003_v17, %v5491_v24 }
 0x588   :  { %v5564_v45 = vpop.f32.mrf.mxu0 }
 0x589   :  { %v5565_v44 = vadd.f32 %v5564_v45, %v5483_v29  ;;  %v5649_v28 = vadd.f32 %v8008_v53, %v5571_v33  ;;  %v7153_v53 = vsub.s32 3, %v8492_v6 }
 0x58b   :  { %v7144_v45 = vsel %vm102_vm0, %v5649_v28, 0.0 }
 0x5e0   :  { %v8018_v43 = vpop.f32.mrf.mxu1 }
 0x5e2   :  { %v5816_v48 = vpop.f32.mrf.mxu1 }
 0x5e4   :  { %v8028_v22 = vpop.f32.mrf.mxu1 }
 0x5e6   :  { %v5977_v36 = vpop.f32.mrf.mxu1 }
 0x5e8   :  { %v8013_v25 = vpop.f32.mrf.mxu0  ;;  %v8038_v55 = vpop.f32.mrf.mxu1 }
 0x5e9   :  { %v5823_v1 = vadd.f32 %v8018_v43, %v8013_v25  ;;  %v5643_v25 = vadd.f32 %v9072_v52, %v5565_v44  ;;  %v7186_v44 = vsub.s32 4, %v8492_v6 }
 0x5ea   :  { %v5730_v32 = vpop.f32.mrf.mxu0  ;;  %v6137_v58 = vpop.f32.mrf.mxu1 }
 0x5eb   :  { %v5817_v40 = vadd.f32 %v5816_v48, %v5730_v32 }
 0x5ec   :  { %v8023_v56 = vpop.f32.mrf.mxu0 }
 0x5ed   :  { %v5904_v54 = vadd.f32 %v8023_v56, %v5823_v1 }
 0x5ee   :  { %v5896_v59 = vpop.f32.mrf.mxu0 }
 0x5ef   :  { %v5897_v13 = vadd.f32 %v5896_v59, %v5817_v40  ;;  %v5986_v50 = vadd.f32 %v8028_v22, %v5904_v54 }
 0x5f0   :  { %v8033_v62 = vpop.f32.mrf.mxu0 }
 0x5f1   :  { %v5978_v7 = vadd.f32 %v5977_v36, %v5897_v13  ;;  %v6066_v31 = vadd.f32 %v8033_v62, %v5986_v50 }
 0x5f2   :  { %v6059_v57 = vpop.f32.mrf.mxu0 }
 0x5f3   :  { %v6060_v38 = vadd.f32 %v6059_v57, %v5978_v7  ;;  %v6144_v41 = vadd.f32 %v8038_v55, %v6066_v31 }
 0x5f5   :  { %v6138_v43 = vadd.f32 %v6137_v58, %v6060_v38  ;;  %v7145_v17 = vsel %vm102_vm0, %v6144_v41, 0.0 }
 0x5f7   :  { %v7138_v62 = vsel %vm102_vm0, %v6138_v43, 0.0 }
 0x5f8   :  { %v8048_v34 = vpop.f32.mrf.mxu1 }
 0x5fa   :  { %v6311_v63 = vpop.f32.mrf.mxu1 }
 0x5fc   :  { %v8058_v0 = vpop.f32.mrf.mxu1 }
 0x5fe   :  { %v6472_v46 = vpop.f32.mrf.mxu1 }
 0x600   :  { %v8043_v61 = vpop.f32.mrf.mxu0  ;;  %v8068_v19 = vpop.f32.mrf.mxu1 }
 0x601   :  { %v6318_v11 = vadd.f32 %v8048_v34, %v8043_v61  ;;  %v7137_v61 = vsel %vm102_vm0, %v5643_v25, 0.0 }
 0x602   :  { %v6225_v16 = vpop.f32.mrf.mxu0  ;;  %v6632_v49 = vpop.f32.mrf.mxu1 }
 0x603   :  { %v6312_v14 = vadd.f32 %v6311_v63, %v6225_v16 }
 0x604   :  { %v8053_v60 = vpop.f32.mrf.mxu0 }
 0x605   :  { %v6399_v15 = vadd.f32 %v8053_v60, %v6318_v11  ;;  %v7139_v60 = vadd.f32 %v7138_v62, %v7137_v61 }
 0x606   :  { %v6391_v5 = vpop.f32.mrf.mxu0 }
 0x607   :  { %v6392_v23 = vadd.f32 %v6391_v5, %v6312_v14  ;;  %v6481_v27 = vadd.f32 %v8058_v0, %v6399_v15  ;;  %v7146_v0 = vadd.f32 %v7145_v17, %v7144_v45 }
 0x608   :  { %v8063_v21 = vpop.f32.mrf.mxu0 }
 0x609   :  { %v6473_v4 = vadd.f32 %v6472_v46, %v6392_v23  ;;  %v6561_v39 = vadd.f32 %v8063_v21, %v6481_v27 }
 0x60a   :  { %v6554_v30 = vpop.f32.mrf.mxu0 }
 0x60b   :  { %v6555_v42 = vadd.f32 %v6554_v30, %v6473_v4  ;;  %v6639_v48 = vadd.f32 %v8068_v19, %v6561_v39 }
 0x60d   :  { %v6633_v32 = vadd.f32 %v6632_v49, %v6555_v42  ;;  %v7147_v58 = vsel %vm102_vm0, %v6639_v48, 0.0  ;;  %v8150_v49 = vld [vmem:[%s9106_s5] sm:$0x3f]  ;;  %s8293_s5 = smov [#allocation11]  }
 0x60e   :  { %v7148_v1 = vadd.f32 %v7147_v58, %v7146_v0  ;;  %v7154_v5 = vrot.slane %v8150_v49, %v7153_v53  ;;  %v7187_v41 = vrot.slane %v8150_v49, %v7186_v44  ;;  %s7203_s7 = sshll.u32 %s8293_s5, 4  ;;  %s7204_s7 = int_to_ptr.vmem [resolvable:$true] %s7203_s7 }
 0x60f   :  { %v7140_v46 = vsel %vm102_vm0, %v6633_v32, 0.0  ;;  %s8251_s8 = scalar_lea.vmem %s7204_s7, 256  ;;  %p8256_p12 = scmp.lt.s32.totalorder %s7204_s7, %s7204_s7 }
 0x610   :  { %v7141_v11 = vadd.f32 %v7140_v46, %v7139_v60  ;;  %p8252_p11 = scmp.ne.s32.totalorder %s7204_s7, %s8251_s8  ;;  %p8257_p13 = scmp.lt.s32.totalorder %s8251_s8, %s8251_s8 }
 0x612   :  { %p8258_p0 = por %p8257_p13, %p8256_p12 }
 0x614   :  { %p8259_p1 = pnand %p8258_p0, %p8252_p11 }
 0x62d   :  { %v8078_v10 = vpop.f32.mrf.mxu1 }
 0x62f   :  { %v6806_v26 = vpop.f32.mrf.mxu1 }
 0x631   :  { %v8088_v35 = vpop.f32.mrf.mxu1 }
 0x633   :  { %v6967_v9 = vpop.f32.mrf.mxu1 }
 0x635   :  { %v8073_v37 = vpop.f32.mrf.mxu0  ;;  %v8098_v55 = vpop.f32.mrf.mxu1 }
 0x636   :  { %v6813_v51 = vadd.f32 %v8078_v10, %v8073_v37 }
 0x637   :  { %v6720_v20 = vpop.f32.mrf.mxu0  ;;  %v7127_v8 = vpop.f32.mrf.mxu1 }
 0x638   :  { %v6807_v22 = vadd.f32 %v6806_v26, %v6720_v20  ;;  %v7192_v20 = vsub.s32 5, %v8492_v6 }
 0x639   :  { %v8083_v2 = vpop.f32.mrf.mxu0 }
 0x63a   :  { %v6894_v47 = vadd.f32 %v8083_v2, %v6813_v51  ;;  %v7193_v28 = vrot.slane %v8150_v49, %v7192_v20 }
 0x63b   :  { %v6886_v36 = vpop.f32.mrf.mxu0 }
 0x63c   :  { %v6887_v56 = vadd.f32 %v6886_v36, %v6807_v22  ;;  %v6976_v59 = vadd.f32 %v8088_v35, %v6894_v47 }
 0x63d   :  { %v8093_v34 = vpop.f32.mrf.mxu0 }
 0x63e   :  { %v7056_v63 = vadd.f32 %v8093_v34, %v6976_v59  ;;  %v6968_v57 = vadd.f32 %v6967_v9, %v6887_v56 }
 0x63f   :  { %v7049_v52 = vpop.f32.mrf.mxu0 }
 0x640   :  { %v7134_v16 = vadd.f32 %v8098_v55, %v7056_v63  ;;  %v7050_v19 = vadd.f32 %v7049_v52, %v6968_v57 }
 0x642   :  { %v7149_v40 = vsel %vm102_vm0, %v7134_v16, 0.0  ;;  %v7128_v54 = vadd.f32 %v7127_v8, %v7050_v19 }
 0x643   :  { %v7150_v3 = vadd.f32 %v7149_v40, %v7148_v1 }
 0x644   :  { %v7142_v12 = vsel %vm102_vm0, %v7128_v54, 0.0 }
 0x645   :  { %v7156_v10 = vadd.f32 %v7154_v5, %v7150_v3  ;;  %v7143_v13 = vadd.f32 %v7142_v12, %v7141_v11 }
 0x647   :  { %v7160_v14 = vsel %vm102_vm0, %v7156_v10, 0.0  ;;  %v7155_v15 = vadd.f32 %v7154_v5, %v7143_v13 }
 0x648   :  { %7161 = vadd.xlane.f32.xlu1 %v7160_v14 }
 0x649   :  { %v7157_v18 = vsel %vm102_vm0, %v7155_v15, 0.0 }
 0x64a   :  { %7158 = vadd.xlane.f32.xlu0 %v7157_v18 }
 0x6d1   :  { %v7162_v21 = vpop.xlane.xlu1 %7161 }
 0x6d2   :  { %v7165_v50 = vmul.f32 0.03125, %v7162_v21 }
 0x6d3   :  { %v7159_v23 = vpop.xlane.xlu0 %7158 }
 0x6d4   :  { %v7164_v24 = vmul.f32 0.03125, %v7159_v23  ;;  %v7167_v26 = vsub.f32 %v7156_v10, %v7165_v50 }
 0x6d6   :  { %v7166_v7 = vsub.f32 %v7155_v15, %v7164_v24  ;;  %v7169_v30 = vmul.f32 %v7167_v26, %v7167_v26 }
 0x6d8   :  { %v7168_v27 = vmul.f32 %v7166_v7, %v7166_v7  ;;  %v7173_v31 = vsel %vm102_vm0, %v7169_v30, 0.0 }
 0x6da   :  { %v7170_v29 = vsel %vm102_vm0, %v7168_v27, 0.0 }
 0x6db   :  { %7171 = vadd.xlane.f32.xlu0 %v7170_v29 }
 0x6df   :  { %7174 = vadd.xlane.f32.xlu0 %v7173_v31 }
 0x764   :  { %v7172_v4 = vpop.xlane.xlu0 %7171 }
 0x765   :  { %v7176_v33 = vmul.f32 0.03125, %v7172_v4 }
 0x767   :  { %v7178_v35 = vadd.f32 1e-05, %v7176_v33 }
 0x768   :  { %v7175_v37 = vpop.xlane.xlu0 %7174 }
 0x769   :  { %8146 = vrsqrt.f32 %v7178_v35  ;;  %v7177_v38 = vmul.f32 0.03125, %v7175_v37 }
 0x76b   :  { %v7179_v39 = vadd.f32 1e-05, %v7177_v38 }
 0x76d   :  { %8148 = vrsqrt.f32 %v7179_v39 }
 0x776   :  { %v8147_v42 = vpop.eup %8146 }
 0x777   :  { %v7182_v51 = vmul.f32 %v8147_v42, %v7166_v7 }
 0x779   :  { %v7188_v9 = vmul.f32 %v7187_v41, %v7182_v51 }
 0x77a   :  { %v8149_v2 = vpop.eup %8148 }
 0x77b   :  { %v7183_v43 = vmul.f32 %v8149_v2, %v7167_v26  ;;  %v7194_v48 = vadd.f32 %v7193_v28, %v7188_v9 }
 0x77d   :  { %v7189_v22 = vmul.f32 %v7187_v41, %v7183_v43  ;;  %7196 = vst.msk [vmem:[#allocation11] sm:$0xff] %vm102_vm0, %v7194_v48 }
 0x77f   :  { %v7195_v47 = vadd.f32 %v7193_v28, %v7189_v22 }
 0x781   :  { %7197 = vst.msk [vmem:[#allocation11 + $0x8] sm:$0xff] %vm102_vm0, %v7195_v47 }
 0x782   :  { %8262 = shalt.err (!%p8259_p1)
}
 0x783   :  { %7209 = dma.vmem_to_hbm [thread:$0]  %s7204_s7, 256, %s9107_s6, [#allocation4], %s8281_s26, %s8281_s26, %s8282_s27  }
 0x784   :  { %8277 = dma.done.wait [#allocation4], 256  }
 0x785   :  { %8278 = vsyncadd [#allocation4], 4294967040 }
 0x786   :  { %7213 = vsyncpa [#allocation3], 1 }
 0x787   :  { %7214 = vsyncpa [#allocation6], 1 }
 0x788   :  { %7215 = vsyncpa [#allocation9], 1 }
 0x789   :  { %7216 = vsyncpa [#allocation4], 1 }

</bundles_post_ra>
